<compile_context>
chip_gen: v7x
topology: tpu7x:2x2x1
jax: 0.10.0
libtpu: 0.0.40
codegen_flags: <defaults>
</compile_context>

<pallas_src>
import functools
import math

import jax
import jax.numpy as jnp
from jax.experimental import pallas as pl
from jax.experimental.pallas import tpu as pltpu

F32 = jnp.float32
BF16 = jnp.bfloat16

DIM = 64            # Restormer feature dim
OPT_CH = 4
SAR_CH = 1
CIN_PAD = 8         # each raw modality zero-padded to 8 lanes
CIN2 = 2 * CIN_PAD  # combined [opt|sar] input lanes
KPATCH = 9 * CIN2   # 144 = 3x3 im2col width

VMEM_LIMIT = 32 * 1024 * 1024


# -----------------------------------------------------------------------------
# tiling helper
# -----------------------------------------------------------------------------
def _pick_tile(n, unit, prefer_steps=4):
    """Largest dividing tile that is a multiple of `unit`, preferring >= prefer_steps
    grid steps (keeps both v7x TensorCores fed / pipelining slack), then >=2 steps,
    then the largest divisor.  Falls back to the full extent (correct, single-step,
    no pipelining) when nothing divides."""
    cands = [t for t in (2048, 1024, 512, 256, 128, 64, 32, 16, 8)
             if t <= n and t % unit == 0 and n % t == 0]
    if not cands:
        return n
    for min_steps in (prefer_steps, 2, 1):
        for t in cands:                       # descending
            if n // t >= min_steps:
                return t
    return cands[0]


# -----------------------------------------------------------------------------
# kernel 1: combined opt|sar encoder (patch-embed + fused base|detail heads)
# -----------------------------------------------------------------------------
def _encoder_kernel(patch_ref, wpe_ref, bpe_ref, wbd_ref, bbd_ref, out_ref):
    # patch: (TP, 144) bf16 im2col rows of the combined [opt|sar] input
    embed = jnp.dot(patch_ref[...], wpe_ref[...], preferred_element_type=F32)
    embed = jnp.maximum(embed + bpe_ref[...], 0.0)                        # (TP, 128)
    bd = jnp.dot(embed.astype(BF16), wbd_ref[...], preferred_element_type=F32)
    out_ref[...] = jnp.maximum(bd + bbd_ref[...], 0.0).astype(BF16)       # (TP, 256)


def encoder_forward(patch, wpe, bpe, wbd, bbd):
    HW = patch.shape[0]
    TP = _pick_tile(HW, 8)
    full = lambda i: (0, 0)
    tile = lambda i: (i, 0)
    return pl.pallas_call(
        _encoder_kernel,
        out_shape=jax.ShapeDtypeStruct((HW, 4 * DIM), BF16),
        grid=(HW // TP,),
        in_specs=[
            pl.BlockSpec((TP, KPATCH), tile),
            pl.BlockSpec((KPATCH, 2 * DIM), full),
            pl.BlockSpec((1, 2 * DIM), full),
            pl.BlockSpec((2 * DIM, 4 * DIM), full),
            pl.BlockSpec((1, 4 * DIM), full),
        ],
        out_specs=pl.BlockSpec((TP, 4 * DIM), tile),
        compiler_params=pltpu.CompilerParams(
            dimension_semantics=("parallel",), vmem_limit_bytes=VMEM_LIMIT),
    )(patch, wpe, bpe, wbd, bbd)


# -----------------------------------------------------------------------------
# kernel 2: Re(fft2) of all channels + both fusion-attention streams (fused)
# -----------------------------------------------------------------------------
def _dft_fusion_kernel(m_ref, feat_ref, w1_ref, b1_ref, w2_ref, b2_ref, out_ref):
    # m: (TP, HW) bf16 rows of the real 2-D DFT matrix (streamed);
    # feat: (HW, 256) bf16 resident [opt_base|opt_detail|sar_base|sar_detail]
    freq = jnp.dot(m_ref[...], feat_ref[...], preferred_element_type=F32)  # (TP, 256)
    h = jnp.maximum(
        jnp.dot(freq.astype(BF16), w1_ref[...], preferred_element_type=F32)
        + b1_ref[...], 0.0)                                                # (TP, 128)
    a = jax.nn.sigmoid(
        jnp.dot(h.astype(BF16), w2_ref[...], preferred_element_type=F32)
        + b2_ref[...])                                                     # (TP, 128)
    opt_f = freq[:, :2 * DIM]
    sar_f = freq[:, 2 * DIM:]
    out_ref[...] = (opt_f * a + sar_f * (1.0 - a)).astype(BF16)            # (TP, 128)


def dft_fusion_forward(feat, m, w1, b1, w2, b2):
    HW = feat.shape[0]
    TP = _pick_tile(HW, 8)
    full = lambda i: (0, 0)
    tile = lambda i: (i, 0)
    return pl.pallas_call(
        _dft_fusion_kernel,
        out_shape=jax.ShapeDtypeStruct((HW, 2 * DIM), BF16),
        grid=(HW // TP,),
        in_specs=[
            pl.BlockSpec((TP, HW), tile),           # streamed DFT-matrix row tile
            pl.BlockSpec((HW, 4 * DIM), full),      # resident bf16 features
            pl.BlockSpec((4 * DIM, 2 * DIM), full),
            pl.BlockSpec((1, 2 * DIM), full),
            pl.BlockSpec((2 * DIM, 2 * DIM), full),
            pl.BlockSpec((1, 2 * DIM), full),
        ],
        out_specs=pl.BlockSpec((TP, 2 * DIM), tile),
        compiler_params=pltpu.CompilerParams(
            dimension_semantics=("parallel",), vmem_limit_bytes=VMEM_LIMIT),
    )(m, feat, w1, b1, w2, b2)


# -----------------------------------------------------------------------------
# kernel 3: Re(ifft2) + decoder (1x1 reduce, ReLU, 3x3 conv, residual, sigmoid)
# -----------------------------------------------------------------------------
def _idft_decoder_kernel(mpad_ref, ff_ref, inp_ref, wr_ref, br_ref, wo_ref, bo_ref,
                         out_ref, *, H, W, TP):
    HW = H * W
    TPW = TP + 4 * W
    i = pl.program_id(0)
    r0 = pl.multiple_of(i * TP, TP)
    inv = 1.0 / (H * W)

    # inverse real DFT of the fused spectra for this row tile plus a 2W-row halo
    # (mpad has 2W zero rows top/bottom, so halo rows outside the image come out 0)
    mwin = mpad_ref[pl.ds(r0, TPW), :]                                     # (TPW, HW)
    bd = jnp.dot(mwin, ff_ref[...], preferred_element_type=F32) * inv      # (TPW, 128)

    red = jnp.dot(bd.astype(BF16), wr_ref[...], preferred_element_type=F32)
    red = jnp.maximum(red + br_ref[...], 0.0)                              # (TPW, 64)
    # zero the halo rows so the 3x3 conv keeps exact zero-padding semantics
    prow = jax.lax.broadcasted_iota(jnp.int32, (TPW, 1), 0) + r0
    valid = jnp.logical_and(prow >= 2 * W, prow < HW + 2 * W)
    red = jnp.where(valid, red, 0.0).astype(BF16)

    # 3x3 conv as ONE K=576 matmul: lane-concat the 9 shifted/masked windows
    col = jax.lax.broadcasted_iota(jnp.int32, (TP, 1), 0) % W              # TP % W == 0
    parts = []
    for dy in range(3):
        for dx in range(3):
            off = 2 * W + (dy - 1) * W + (dx - 1)                          # static
            s = red[off:off + TP, :]
            if dx == 0:
                s = jnp.where(col == 0, 0, s)                              # left border
            elif dx == 2:
                s = jnp.where(col == W - 1, 0, s)                          # right border
            parts.append(s)
    patch = jnp.concatenate(parts, axis=1)                                 # (TP, 576)
    conv = jnp.dot(patch, wo_ref[...], preferred_element_type=F32) + bo_ref[...]
    out_ref[...] = jax.nn.sigmoid(conv + inp_ref[...])                     # (TP, 8) f32


def idft_decoder_forward(mpad, fused_freq, inp_rows, wr, br, wo, bo, H, W):
    HW = H * W
    TP = _pick_tile(HW, (8 * W) // math.gcd(8, W))   # multiple of 8 and of W
    full = lambda i: (0, 0)
    tile = lambda i: (i, 0)
    kernel = functools.partial(_idft_decoder_kernel, H=H, W=W, TP=TP)
    return pl.pallas_call(
        kernel,
        out_shape=jax.ShapeDtypeStruct((HW, CIN_PAD), F32),
        grid=(HW // TP,),
        in_specs=[
            pl.BlockSpec((HW + 4 * W, HW), full),   # resident zero-padded DFT matrix
            pl.BlockSpec((HW, 2 * DIM), full),      # resident fused spectra (bf16)
            pl.BlockSpec((TP, CIN_PAD), tile),      # opt residual (padded to 8 lanes)
            pl.BlockSpec((2 * DIM, DIM), full),
            pl.BlockSpec((1, DIM), full),
            pl.BlockSpec((9 * DIM, CIN_PAD), full),
            pl.BlockSpec((1, CIN_PAD), full),
        ],
        out_specs=pl.BlockSpec((TP, CIN_PAD), tile),
        compiler_params=pltpu.CompilerParams(
            dimension_semantics=("parallel",), vmem_limit_bytes=VMEM_LIMIT),
    )(mpad, fused_freq, inp_rows, wr, br, wo, bo)


# -----------------------------------------------------------------------------
# parameters (stand-in) and packing (bf16, fused / block-structured forms)
# -----------------------------------------------------------------------------
def init_params():
    keys = iter(jax.random.split(jax.random.PRNGKey(42), 64))
    w = lambda shape, s=0.05: s * jax.random.normal(next(keys), shape, F32)
    z = lambda shape: jnp.zeros(shape, F32)
    p = {}
    for name, cin in (("opt", OPT_CH), ("sar", SAR_CH)):
        p[f"{name}_pe_w"] = w((9, cin, DIM))
        p[f"{name}_pe_b"] = z((DIM,))
        p[f"{name}_base_w"] = w((DIM, DIM))
        p[f"{name}_base_b"] = z((DIM,))
        p[f"{name}_detail_w"] = w((DIM, DIM))
        p[f"{name}_detail_b"] = z((DIM,))
    # FusionLayerWithAttention (Conv2d(2C,C,1) -> ReLU -> Conv2d(C,C,1) -> Sigmoid)
    for name in ("fb", "fd"):
        p[f"{name}_w1"] = w((2 * DIM, DIM))          # rows = [opt(64); sar(64)]
        p[f"{name}_b1"] = z((DIM,))
        p[f"{name}_w2"] = w((DIM, DIM))
        p[f"{name}_b2"] = z((DIM,))
    p["dec_reduce_w"] = w((2 * DIM, DIM))
    p["dec_reduce_b"] = z((DIM,))
    p["dec_out_w"] = w((9, DIM, OPT_CH))
    p["dec_out_b"] = z((OPT_CH,))
    return p


def dft_real_matrix(H, W):
    """Kronecker-form real 2-D DFT matrix: M[uW+v, hW+w] = cos(2*pi*(uh/H + vw/W)).
       Re(fft2(X)) = M @ vec(X);  Re(ifft2(R)) = (M @ vec(R)) / (H*W) for real R."""
    u = jnp.arange(H, dtype=F32)
    v = jnp.arange(W, dtype=F32)
    ah = 2.0 * jnp.pi * jnp.outer(u, u) / H
    aw = 2.0 * jnp.pi * jnp.outer(v, v) / W
    m = (jnp.cos(ah)[:, None, :, None] * jnp.cos(aw)[None, :, None, :]
         - jnp.sin(ah)[:, None, :, None] * jnp.sin(aw)[None, :, None, :])
    return m.reshape(H * W, H * W)


def pack_params(p, H, W):
    q = {}
    # combined opt|sar encoder: block weights so one kernel serves both modalities
    wpe = jnp.zeros((9, CIN2, 2 * DIM), F32)
    wpe = wpe.at[:, :OPT_CH, :DIM].set(p["opt_pe_w"])
    wpe = wpe.at[:, CIN_PAD:CIN_PAD + SAR_CH, DIM:].set(p["sar_pe_w"])
    q["enc_pe_w"] = wpe.reshape(KPATCH, 2 * DIM).astype(BF16)
    q["enc_pe_b"] = jnp.concatenate([p["opt_pe_b"], p["sar_pe_b"]]).reshape(1, 2 * DIM)
    wbd = jnp.zeros((2 * DIM, 4 * DIM), F32)
    wbd = wbd.at[:DIM, :DIM].set(p["opt_base_w"])
    wbd = wbd.at[:DIM, DIM:2 * DIM].set(p["opt_detail_w"])
    wbd = wbd.at[DIM:, 2 * DIM:3 * DIM].set(p["sar_base_w"])
    wbd = wbd.at[DIM:, 3 * DIM:].set(p["sar_detail_w"])
    q["enc_bd_w"] = wbd.astype(BF16)
    q["enc_bd_b"] = jnp.concatenate(
        [p["opt_base_b"], p["opt_detail_b"], p["sar_base_b"], p["sar_detail_b"]]
    ).reshape(1, 4 * DIM)
    # fusion attention: one concatenated (256,128) layer-1 weight, block-diag layer 2
    w1 = jnp.zeros((4 * DIM, 2 * DIM), F32)
    w1 = w1.at[:DIM, :DIM].set(p["fb_w1"][:DIM])           # opt_base  -> h_base
    w1 = w1.at[DIM:2 * DIM, DIM:].set(p["fd_w1"][:DIM])    # opt_detail-> h_detail
    w1 = w1.at[2 * DIM:3 * DIM, :DIM].set(p["fb_w1"][DIM:])  # sar_base -> h_base
    w1 = w1.at[3 * DIM:, DIM:].set(p["fd_w1"][DIM:])       # sar_detail-> h_detail
    q["fu_w1"] = w1.astype(BF16)
    q["fu_b1"] = jnp.concatenate([p["fb_b1"], p["fd_b1"]]).reshape(1, 2 * DIM)
    w2 = jnp.zeros((2 * DIM, 2 * DIM), F32)
    w2 = w2.at[:DIM, :DIM].set(p["fb_w2"])
    w2 = w2.at[DIM:, DIM:].set(p["fd_w2"])
    q["fu_w2"] = w2.astype(BF16)
    q["fu_b2"] = jnp.concatenate([p["fb_b2"], p["fd_b2"]]).reshape(1, 2 * DIM)
    # decoder (output channels padded 4 -> 8 lanes)
    q["dec_reduce_w"] = p["dec_reduce_w"].astype(BF16)
    q["dec_reduce_b"] = p["dec_reduce_b"].reshape(1, DIM)
    wo = jnp.zeros((9, DIM, CIN_PAD), F32).at[:, :, :OPT_CH].set(p["dec_out_w"])
    q["dec_out_w"] = wo.reshape(9 * DIM, CIN_PAD).astype(BF16)
    q["dec_out_b"] = jnp.zeros((1, CIN_PAD), F32).at[0, :OPT_CH].set(p["dec_out_b"])
    # real 2-D DFT matrices, precomputed OUTSIDE jit, bf16 MXU operands
    m = dft_real_matrix(H, W).astype(BF16)
    q["dft_m"] = m
    zpad = jnp.zeros((2 * W, H * W), BF16)
    q["dft_mpad"] = jnp.concatenate([zpad, m, zpad], axis=0)
    return q


# -----------------------------------------------------------------------------
# wrapper-side layout plumbing (cheap XLA)
# -----------------------------------------------------------------------------
def im2col_rows(x_rows, H, W):
    """(HW, C) rows -> (HW, 9C) 3x3 zero-padded im2col, shift order k = dy*3+dx."""
    HW, C = x_rows.shape
    xp = jnp.zeros((H + 2, W + 2, C), x_rows.dtype)
    xp = xp.at[1:H + 1, 1:W + 1].set(x_rows.reshape(H, W, C))
    cols = [xp[dy:dy + H, dx:dx + W, :].reshape(HW, C)
            for dy in range(3) for dx in range(3)]
    return jnp.concatenate(cols, axis=1)


# -----------------------------------------------------------------------------
# forward
# -----------------------------------------------------------------------------
@jax.jit
def my_restormer_forward(q, opt, sar):
    # PyTorch forward() returns inside the per-region loop -> only region 0 is used.
    _, _, H, W = opt.shape
    HW = H * W
    opt0 = opt[0].transpose(1, 2, 0).reshape(HW, OPT_CH)          # rows layout
    sar0 = sar[0].transpose(1, 2, 0).reshape(HW, SAR_CH)

    # combined [opt|sar] input rows (lane-padded) and 3x3 im2col (bf16)
    x_rows = jnp.zeros((HW, CIN2), F32)
    x_rows = x_rows.at[:, :OPT_CH].set(opt0)
    x_rows = x_rows.at[:, CIN_PAD:CIN_PAD + SAR_CH].set(sar0)
    patch = im2col_rows(x_rows.astype(BF16), H, W)                # (HW, 144)

    # 1) encoders (both modalities in one kernel) -> (HW, 256) bf16
    feat = encoder_forward(patch, q["enc_pe_w"], q["enc_pe_b"],
                           q["enc_bd_w"], q["enc_bd_b"])

    # 2) Re(fft2) of all 256 channels + both fusion-attention streams -> (HW, 128)
    fused_freq = dft_fusion_forward(feat, q["dft_m"], q["fu_w1"], q["fu_b1"],
                                    q["fu_w2"], q["fu_b2"])

    # 3) Re(ifft2) + decoder (reduce, ReLU, 3x3 conv, residual, sigmoid) -> (HW, 8)
    inp_rows = jnp.zeros((HW, CIN_PAD), F32).at[:, :OPT_CH].set(opt0)
    out_rows = idft_decoder_forward(q["dft_mpad"], fused_freq, inp_rows,
                                    q["dec_reduce_w"], q["dec_reduce_b"],
                                    q["dec_out_w"], q["dec_out_b"], H, W)

    fused_img = out_rows[:, :OPT_CH].reshape(H, W, OPT_CH).transpose(2, 0, 1)[None]
    # region_fusion_results holds a single element when the (early) return fires
    return fused_img


if __name__ == "__main__":
    key = jax.random.PRNGKey(0)
    k_opt, k_sar = jax.random.split(key)
    H = W = 16
    opt = jax.random.normal(k_opt, (2, OPT_CH, H, W), F32)
    sar = jax.random.normal(k_sar, (2, SAR_CH, H, W), F32)

    q = pack_params(init_params(), H, W)      # incl. DFT matrices, built outside jit

    out = my_restormer_forward(q, opt, sar)
    out = jax.block_until_ready(out)
    assert out.shape == (1, OPT_CH, H, W), out.shape
    assert bool(jnp.all(jnp.isfinite(out)))
    print("KERNEL_OK")
</pallas_src>

<mosaic_0001>
module attributes {stable_mosaic.version = 11 : i64} {
  func.func @_encoder_kernel(%arg0: i32, %arg1: memref<64x144xbf16, #tpu.memory_space<vmem>>, %arg2: memref<144x128xbf16, #tpu.memory_space<vmem>>, %arg3: memref<1x128xf32, #tpu.memory_space<vmem>>, %arg4: memref<128x256xbf16, #tpu.memory_space<vmem>>, %arg5: memref<1x256xf32, #tpu.memory_space<vmem>>, %arg6: memref<64x256xbf16, #tpu.memory_space<vmem>>) attributes {dimension_semantics = [#tpu.dimension_semantics<parallel>], iteration_bounds = array<i64: 4>, scalar_prefetch = 0 : i64, scratch_operands = 0 : i64, tpu.core_type = #tpu.core_type<tc>, window_params = [{transform_indices = @transform_0, window_bounds = array<i64: 64, 144>}, {pipeline_mode = #tpu.pipeline_mode<synchronous>, transform_indices = @transform_1, window_bounds = array<i64: 144, 128>}, {pipeline_mode = #tpu.pipeline_mode<synchronous>, transform_indices = @transform_2, window_bounds = array<i64: 1, 128>}, {pipeline_mode = #tpu.pipeline_mode<synchronous>, transform_indices = @transform_3, window_bounds = array<i64: 128, 256>}, {pipeline_mode = #tpu.pipeline_mode<synchronous>, transform_indices = @transform_4, window_bounds = array<i64: 1, 256>}, {transform_indices = @transform_5, window_bounds = array<i64: 64, 256>}]} {
    %c0 = arith.constant 0 : index
    %c0_0 = arith.constant 0 : index
    %0 = vector.load %arg1[%c0, %c0_0] : memref<64x144xbf16, #tpu.memory_space<vmem>>, vector<64x144xbf16>
    %c0_1 = arith.constant 0 : index
    %c0_2 = arith.constant 0 : index
    %1 = vector.load %arg2[%c0_1, %c0_2] : memref<144x128xbf16, #tpu.memory_space<vmem>>, vector<144x128xbf16>
    %cst = arith.constant dense<0.000000e+00> : vector<64x128xf32>
    %2 = tpu.matmul %0, %1, %cst {dimension_numbers = #tpu.dot_dimension_numbers<[1], [0], [0], [1], [0, 0, 1, 1], [], []>} : vector<64x144xbf16>, vector<144x128xbf16>, vector<64x128xf32> -> vector<64x128xf32>
    %c0_3 = arith.constant 0 : index
    %c0_4 = arith.constant 0 : index
    %3 = vector.load %arg3[%c0_3, %c0_4] : memref<1x128xf32, #tpu.memory_space<vmem>>, vector<1x128xf32>
    %4 = vector.broadcast %3 : vector<1x128xf32> to vector<64x128xf32>
    %5 = arith.addf %2, %4 : vector<64x128xf32>
    %cst_5 = arith.constant 0.000000e+00 : f32
    %6 = vector.broadcast %cst_5 : f32 to vector<64x128xf32>
    %7 = arith.maximumf %5, %6 : vector<64x128xf32>
    %8 = arith.truncf %7 : vector<64x128xf32> to vector<64x128xbf16>
    %c0_6 = arith.constant 0 : index
    %c0_7 = arith.constant 0 : index
    %9 = vector.load %arg4[%c0_6, %c0_7] : memref<128x256xbf16, #tpu.memory_space<vmem>>, vector<128x256xbf16>
    %cst_8 = arith.constant dense<0.000000e+00> : vector<64x256xf32>
    %10 = tpu.matmul %8, %9, %cst_8 {dimension_numbers = #tpu.dot_dimension_numbers<[1], [0], [0], [1], [0, 0, 1, 1], [], []>} : vector<64x128xbf16>, vector<128x256xbf16>, vector<64x256xf32> -> vector<64x256xf32>
    %c0_9 = arith.constant 0 : index
    %c0_10 = arith.constant 0 : index
    %11 = vector.load %arg5[%c0_9, %c0_10] : memref<1x256xf32, #tpu.memory_space<vmem>>, vector<1x256xf32>
    %12 = vector.broadcast %11 : vector<1x256xf32> to vector<64x256xf32>
    %13 = arith.addf %10, %12 : vector<64x256xf32>
    %cst_11 = arith.constant 0.000000e+00 : f32
    %14 = vector.broadcast %cst_11 : f32 to vector<64x256xf32>
    %15 = arith.maximumf %13, %14 : vector<64x256xf32>
    %16 = arith.truncf %15 : vector<64x256xf32> to vector<64x256xbf16>
    %c0_12 = arith.constant 0 : index
    %c0_13 = arith.constant 0 : index
    %17 = vector.load %arg6[%c0_12, %c0_13] : memref<64x256xbf16, #tpu.memory_space<vmem>>, vector<64x256xbf16>
    tpu.vector_store %arg6[%c0_12, %c0_13], %16 {strides = array<i32>} : memref<64x256xbf16, #tpu.memory_space<vmem>>, vector<64x256xbf16>,
    return
  }
  func.func @transform_0(%arg0: i32) -> (i32, i32) {
    %c0_i32 = arith.constant 0 : i32
    %c0_i32_0 = arith.constant 0 : i32
    return %arg0, %c0_i32 : i32, i32
  }
  func.func @transform_1(%arg0: i32) -> (i32, i32) {
    %c0_i32 = arith.constant 0 : i32
    %c0_i32_0 = arith.constant 0 : i32
    %c0_i32_1 = arith.constant 0 : i32
    return %c0_i32, %c0_i32_0 : i32, i32
  }
  func.func @transform_2(%arg0: i32) -> (i32, i32) {
    %c0_i32 = arith.constant 0 : i32
    %c0_i32_0 = arith.constant 0 : i32
    %c0_i32_1 = arith.constant 0 : i32
    return %c0_i32, %c0_i32_0 : i32, i32
  }
  func.func @transform_3(%arg0: i32) -> (i32, i32) {
    %c0_i32 = arith.constant 0 : i32
    %c0_i32_0 = arith.constant 0 : i32
    %c0_i32_1 = arith.constant 0 : i32
    return %c0_i32, %c0_i32_0 : i32, i32
  }
  func.func @transform_4(%arg0: i32) -> (i32, i32) {
    %c0_i32 = arith.constant 0 : i32
    %c0_i32_0 = arith.constant 0 : i32
    %c0_i32_1 = arith.constant 0 : i32
    return %c0_i32, %c0_i32_0 : i32, i32
  }
  func.func @transform_5(%arg0: i32) -> (i32, i32) {
    %c0_i32 = arith.constant 0 : i32
    %c0_i32_0 = arith.constant 0 : i32
    return %arg0, %c0_i32 : i32, i32
  }
}

module attributes {stable_mosaic.version = 11 : i64} {
  func.func @_dft_fusion_kernel(%arg0: i32, %arg1: memref<64x256xbf16, #tpu.memory_space<vmem>>, %arg2: memref<256x256xbf16, #tpu.memory_space<vmem>>, %arg3: memref<256x128xbf16, #tpu.memory_space<vmem>>, %arg4: memref<1x128xf32, #tpu.memory_space<vmem>>, %arg5: memref<128x128xbf16, #tpu.memory_space<vmem>>, %arg6: memref<1x128xf32, #tpu.memory_space<vmem>>, %arg7: memref<64x128xbf16, #tpu.memory_space<vmem>>) attributes {dimension_semantics = [#tpu.dimension_semantics<parallel>], iteration_bounds = array<i64: 4>, scalar_prefetch = 0 : i64, scratch_operands = 0 : i64, tpu.core_type = #tpu.core_type<tc>, window_params = [{transform_indices = @transform_0, window_bounds = array<i64: 64, 256>}, {pipeline_mode = #tpu.pipeline_mode<synchronous>, transform_indices = @transform_1, window_bounds = array<i64: 256, 256>}, {pipeline_mode = #tpu.pipeline_mode<synchronous>, transform_indices = @transform_2, window_bounds = array<i64: 256, 128>}, {pipeline_mode = #tpu.pipeline_mode<synchronous>, transform_indices = @transform_3, window_bounds = array<i64: 1, 128>}, {pipeline_mode = #tpu.pipeline_mode<synchronous>, transform_indices = @transform_4, window_bounds = array<i64: 128, 128>}, {pipeline_mode = #tpu.pipeline_mode<synchronous>, transform_indices = @transform_5, window_bounds = array<i64: 1, 128>}, {transform_indices = @transform_6, window_bounds = array<i64: 64, 128>}]} {
    %c0 = arith.constant 0 : index
    %c0_0 = arith.constant 0 : index
    %0 = vector.load %arg1[%c0, %c0_0] : memref<64x256xbf16, #tpu.memory_space<vmem>>, vector<64x256xbf16>
    %c0_1 = arith.constant 0 : index
    %c0_2 = arith.constant 0 : index
    %1 = vector.load %arg2[%c0_1, %c0_2] : memref<256x256xbf16, #tpu.memory_space<vmem>>, vector<256x256xbf16>
    %cst = arith.constant dense<0.000000e+00> : vector<64x256xf32>
    %2 = tpu.matmul %0, %1, %cst {dimension_numbers = #tpu.dot_dimension_numbers<[1], [0], [0], [1], [0, 0, 1, 1], [], []>} : vector<64x256xbf16>, vector<256x256xbf16>, vector<64x256xf32> -> vector<64x256xf32>
    %3 = arith.truncf %2 : vector<64x256xf32> to vector<64x256xbf16>
    %c0_3 = arith.constant 0 : index
    %c0_4 = arith.constant 0 : index
    %4 = vector.load %arg3[%c0_3, %c0_4] : memref<256x128xbf16, #tpu.memory_space<vmem>>, vector<256x128xbf16>
    %cst_5 = arith.constant dense<0.000000e+00> : vector<64x128xf32>
    %5 = tpu.matmul %3, %4, %cst_5 {dimension_numbers = #tpu.dot_dimension_numbers<[1], [0], [0], [1], [0, 0, 1, 1], [], []>} : vector<64x256xbf16>, vector<256x128xbf16>, vector<64x128xf32> -> vector<64x128xf32>
    %c0_6 = arith.constant 0 : index
    %c0_7 = arith.constant 0 : index
    %6 = vector.load %arg4[%c0_6, %c0_7] : memref<1x128xf32, #tpu.memory_space<vmem>>, vector<1x128xf32>
    %7 = vector.broadcast %6 : vector<1x128xf32> to vector<64x128xf32>
    %8 = arith.addf %5, %7 : vector<64x128xf32>
    %cst_8 = arith.constant 0.000000e+00 : f32
    %9 = vector.broadcast %cst_8 : f32 to vector<64x128xf32>
    %10 = arith.maximumf %8, %9 : vector<64x128xf32>
    %11 = arith.truncf %10 : vector<64x128xf32> to vector<64x128xbf16>
    %c0_9 = arith.constant 0 : index
    %c0_10 = arith.constant 0 : index
    %12 = vector.load %arg5[%c0_9, %c0_10] : memref<128x128xbf16, #tpu.memory_space<vmem>>, vector<128x128xbf16>
    %cst_11 = arith.constant dense<0.000000e+00> : vector<64x128xf32>
    %13 = tpu.matmul %11, %12, %cst_11 {dimension_numbers = #tpu.dot_dimension_numbers<[1], [0], [0], [1], [0, 0, 1, 1], [], []>} : vector<64x128xbf16>, vector<128x128xbf16>, vector<64x128xf32> -> vector<64x128xf32>
    %c0_12 = arith.constant 0 : index
    %c0_13 = arith.constant 0 : index
    %14 = vector.load %arg6[%c0_12, %c0_13] : memref<1x128xf32, #tpu.memory_space<vmem>>, vector<1x128xf32>
    %15 = vector.broadcast %14 : vector<1x128xf32> to vector<64x128xf32>
    %16 = arith.addf %13, %15 : vector<64x128xf32>
    %17 = arith.negf %16 : vector<64x128xf32>
    %18 = math.exp %17 : vector<64x128xf32>
    %cst_14 = arith.constant 1.000000e+00 : f32
    %19 = vector.broadcast %cst_14 : f32 to vector<64x128xf32>
    %20 = arith.addf %19, %18 : vector<64x128xf32>
    %21 = arith.divf %19, %20 : vector<64x128xf32>
    %22 = vector.extract_strided_slice %2 {offsets = [0, 0], sizes = [64, 128], strides = [1, 1]} : vector<64x256xf32> to vector<64x128xf32>
    %23 = vector.extract_strided_slice %2 {offsets = [0, 128], sizes = [64, 128], strides = [1, 1]} : vector<64x256xf32> to vector<64x128xf32>
    %24 = arith.mulf %22, %21 : vector<64x128xf32>
    %cst_15 = arith.constant 1.000000e+00 : f32
    %25 = vector.broadcast %cst_15 : f32 to vector<64x128xf32>
    %26 = arith.subf %25, %21 : vector<64x128xf32>
    %27 = arith.mulf %23, %26 : vector<64x128xf32>
    %28 = arith.addf %24, %27 : vector<64x128xf32>
    %29 = arith.truncf %28 : vector<64x128xf32> to vector<64x128xbf16>
    %c0_16 = arith.constant 0 : index
    %c0_17 = arith.constant 0 : index
    %30 = vector.load %arg7[%c0_16, %c0_17] : memref<64x128xbf16, #tpu.memory_space<vmem>>, vector<64x128xbf16>
    tpu.vector_store %arg7[%c0_16, %c0_17], %29 {strides = array<i32>} : memref<64x128xbf16, #tpu.memory_space<vmem>>, vector<64x128xbf16>,
    return
  }
  func.func @transform_0(%arg0: i32) -> (i32, i32) {
    %c0_i32 = arith.constant 0 : i32
    %c0_i32_0 = arith.constant 0 : i32
    return %arg0, %c0_i32 : i32, i32
  }
  func.func @transform_1(%arg0: i32) -> (i32, i32) {
    %c0_i32 = arith.constant 0 : i32
    %c0_i32_0 = arith.constant 0 : i32
    %c0_i32_1 = arith.constant 0 : i32
    return %c0_i32, %c0_i32_0 : i32, i32
  }
  func.func @transform_2(%arg0: i32) -> (i32, i32) {
    %c0_i32 = arith.constant 0 : i32
    %c0_i32_0 = arith.constant 0 : i32
    %c0_i32_1 = arith.constant 0 : i32
    return %c0_i32, %c0_i32_0 : i32, i32
  }
  func.func @transform_3(%arg0: i32) -> (i32, i32) {
    %c0_i32 = arith.constant 0 : i32
    %c0_i32_0 = arith.constant 0 : i32
    %c0_i32_1 = arith.constant 0 : i32
    return %c0_i32, %c0_i32_0 : i32, i32
  }
  func.func @transform_4(%arg0: i32) -> (i32, i32) {
    %c0_i32 = arith.constant 0 : i32
    %c0_i32_0 = arith.constant 0 : i32
    %c0_i32_1 = arith.constant 0 : i32
    return %c0_i32, %c0_i32_0 : i32, i32
  }
  func.func @transform_5(%arg0: i32) -> (i32, i32) {
    %c0_i32 = arith.constant 0 : i32
    %c0_i32_0 = arith.constant 0 : i32
    %c0_i32_1 = arith.constant 0 : i32
    return %c0_i32, %c0_i32_0 : i32, i32
  }
  func.func @transform_6(%arg0: i32) -> (i32, i32) {
    %c0_i32 = arith.constant 0 : i32
    %c0_i32_0 = arith.constant 0 : i32
    return %arg0, %c0_i32 : i32, i32
  }
}

module attributes {stable_mosaic.version = 11 : i64} {
  func.func @_idft_decoder_kernel(%arg0: i32, %arg1: memref<320x256xbf16, #tpu.memory_space<vmem>>, %arg2: memref<256x128xbf16, #tpu.memory_space<vmem>>, %arg3: memref<64x8xf32, #tpu.memory_space<vmem>>, %arg4: memref<128x64xbf16, #tpu.memory_space<vmem>>, %arg5: memref<1x64xf32, #tpu.memory_space<vmem>>, %arg6: memref<576x8xbf16, #tpu.memory_space<vmem>>, %arg7: memref<1x8xf32, #tpu.memory_space<vmem>>, %arg8: memref<64x8xf32, #tpu.memory_space<vmem>>) attributes {dimension_semantics = [#tpu.dimension_semantics<parallel>], iteration_bounds = array<i64: 4>, scalar_prefetch = 0 : i64, scratch_operands = 0 : i64, tpu.core_type = #tpu.core_type<tc>, window_params = [{pipeline_mode = #tpu.pipeline_mode<synchronous>, transform_indices = @transform_0, window_bounds = array<i64: 320, 256>}, {pipeline_mode = #tpu.pipeline_mode<synchronous>, transform_indices = @transform_1, window_bounds = array<i64: 256, 128>}, {transform_indices = @transform_2, window_bounds = array<i64: 64, 8>}, {pipeline_mode = #tpu.pipeline_mode<synchronous>, transform_indices = @transform_3, window_bounds = array<i64: 128, 64>}, {pipeline_mode = #tpu.pipeline_mode<synchronous>, transform_indices = @transform_4, window_bounds = array<i64: 1, 64>}, {pipeline_mode = #tpu.pipeline_mode<synchronous>, transform_indices = @transform_5, window_bounds = array<i64: 576, 8>}, {pipeline_mode = #tpu.pipeline_mode<synchronous>, transform_indices = @transform_6, window_bounds = array<i64: 1, 8>}, {transform_indices = @transform_7, window_bounds = array<i64: 64, 8>}]} {
    %c64_i32 = arith.constant 64 : i32
    %0 = arith.muli %arg0, %c64_i32 : i32
    %1 = tpu.assume_multiple %0, 64 : i32
    %2 = arith.index_cast %1 : i32 to index
    %c0 = arith.constant 0 : index
    %3 = vector.load %arg1[%2, %c0] : memref<320x256xbf16, #tpu.memory_space<vmem>>, vector<128x256xbf16>
    %c0_0 = arith.constant 0 : index
    %c0_1 = arith.constant 0 : index
    %4 = vector.load %arg2[%c0_0, %c0_1] : memref<256x128xbf16, #tpu.memory_space<vmem>>, vector<256x128xbf16>
    %cst = arith.constant dense<0.000000e+00> : vector<128x128xf32>
    %5 = tpu.matmul %3, %4, %cst {dimension_numbers = #tpu.dot_dimension_numbers<[1], [0], [0], [1], [0, 0, 1, 1], [], []>} : vector<128x256xbf16>, vector<256x128xbf16>, vector<128x128xf32> -> vector<128x128xf32>
    %cst_2 = arith.constant 3.906250e-03 : f32
    %6 = vector.broadcast %cst_2 : f32 to vector<128x128xf32>
    %7 = arith.mulf %5, %6 : vector<128x128xf32>
    %8 = arith.truncf %7 : vector<128x128xf32> to vector<128x128xbf16>
    %c0_3 = arith.constant 0 : index
    %c0_4 = arith.constant 0 : index
    %9 = vector.load %arg4[%c0_3, %c0_4] : memref<128x64xbf16, #tpu.memory_space<vmem>>, vector<128x64xbf16>
    %cst_5 = arith.constant dense<0.000000e+00> : vector<128x64xf32>
    %10 = tpu.matmul %8, %9, %cst_5 {dimension_numbers = #tpu.dot_dimension_numbers<[1], [0], [0], [1], [0, 0, 1, 1], [], []>} : vector<128x128xbf16>, vector<128x64xbf16>, vector<128x64xf32> -> vector<128x64xf32>
    %c0_6 = arith.constant 0 : index
    %c0_7 = arith.constant 0 : index
    %11 = vector.load %arg5[%c0_6, %c0_7] : memref<1x64xf32, #tpu.memory_space<vmem>>, vector<1x64xf32>
    %12 = vector.broadcast %11 : vector<1x64xf32> to vector<128x64xf32>
    %13 = arith.addf %10, %12 : vector<128x64xf32>
    %cst_8 = arith.constant 0.000000e+00 : f32
    %14 = vector.broadcast %cst_8 : f32 to vector<128x64xf32>
    %15 = arith.maximumf %13, %14 : vector<128x64xf32>
    %16 = tpu.iota {dimensions = array<i32: 0>} : vector<128x1xi32>
    %17 = vector.broadcast %1 : i32 to vector<128x1xi32>
    %18 = arith.addi %16, %17 : vector<128x1xi32>
    %c32_i32 = arith.constant 32 : i32
    %19 = vector.broadcast %c32_i32 : i32 to vector<128x1xi32>
    %20 = arith.cmpi sge, %18, %19 : vector<128x1xi32>
    %c288_i32 = arith.constant 288 : i32
    %21 = vector.broadcast %c288_i32 : i32 to vector<128x1xi32>
    %22 = arith.cmpi slt, %18, %21 : vector<128x1xi32>
    %23 = arith.andi %20, %22 : vector<128x1xi1>
    %cst_9 = arith.constant 0.000000e+00 : f32
    %24 = vector.shape_cast %23 : vector<128x1xi1> to vector<128x1xi1>
    %25 = vector.broadcast %24 : vector<128x1xi1> to vector<128x64xi1>
    %26 = vector.broadcast %cst_9 : f32 to vector<128x64xf32>
    %27 = arith.select %25, %15, %26 : vector<128x64xi1>, vector<128x64xf32>
    %28 = arith.truncf %27 : vector<128x64xf32> to vector<128x64xbf16>
    %29 = tpu.iota {dimensions = array<i32: 0>} : vector<64x1xi32>
    %c16_i32 = arith.constant 16 : i32
    %c0_i32 = arith.constant 0 : i32
    %30 = arith.cmpi eq, %c16_i32, %c0_i32 : i32
    %c1_i32 = arith.constant 1 : i32
    %31 = arith.select %30, %c1_i32, %c16_i32 : i32
    %32 = vector.broadcast %31 : i32 to vector<64x1xi32>
    %33 = arith.remsi %29, %32 : vector<64x1xi32>
    %c0_i32_10 = arith.constant 0 : i32
    %34 = vector.broadcast %c0_i32_10 : i32 to vector<64x1xi32>
    %35 = arith.cmpi ne, %33, %34 : vector<64x1xi32>
    %c0_i32_11 = arith.constant 0 : i32
    %36 = vector.broadcast %c0_i32_11 : i32 to vector<64x1xi32>
    %37 = arith.cmpi slt, %33, %36 : vector<64x1xi32>
    %c0_i32_12 = arith.constant 0 : i32
    %38 = arith.cmpi slt, %31, %c0_i32_12 : i32
    %39 = vector.broadcast %38 : i1 to vector<64x1xi1>
    %40 = vector.broadcast %39 : vector<64x1xi1> to vector<64x1xi1>
    %41 = arith.xori %37, %40 : vector<64x1xi1>
    %42 = arith.andi %41, %35 : vector<64x1xi1>
    %43 = vector.broadcast %31 : i32 to vector<64x1xi32>
    %44 = arith.addi %33, %43 : vector<64x1xi32>
    %45 = arith.select %42, %44, %33 : vector<64x1xi1>, vector<64x1xi32>
    %46 = vector.extract_strided_slice %28 {offsets = [15, 0], sizes = [64, 64], strides = [1, 1]} : vector<128x64xbf16> to vector<64x64xbf16>
    %c0_i32_13 = arith.constant 0 : i32
    %47 = vector.broadcast %c0_i32_13 : i32 to vector<64x1xi32>
    %48 = arith.cmpi eq, %45, %47 : vector<64x1xi32>
    %c0_i32_14 = arith.constant 0 : i32
    %49 = arith.sitofp %c0_i32_14 : i32 to bf16
    %50 = vector.shape_cast %48 : vector<64x1xi1> to vector<64x1xi1>
    %51 = vector.broadcast %50 : vector<64x1xi1> to vector<64x64xi1>
    %52 = vector.broadcast %49 : bf16 to vector<64x64xbf16>
    %53 = arith.select %51, %52, %46 : vector<64x64xi1>, vector<64x64xbf16>
    %54 = vector.extract_strided_slice %28 {offsets = [16, 0], sizes = [64, 64], strides = [1, 1]} : vector<128x64xbf16> to vector<64x64xbf16>
    %55 = vector.extract_strided_slice %28 {offsets = [17, 0], sizes = [64, 64], strides = [1, 1]} : vector<128x64xbf16> to vector<64x64xbf16>
    %c15_i32 = arith.constant 15 : i32
    %56 = vector.broadcast %c15_i32 : i32 to vector<64x1xi32>
    %57 = arith.cmpi eq, %45, %56 : vector<64x1xi32>
    %c0_i32_15 = arith.constant 0 : i32
    %58 = arith.sitofp %c0_i32_15 : i32 to bf16
    %59 = vector.shape_cast %57 : vector<64x1xi1> to vector<64x1xi1>
    %60 = vector.broadcast %59 : vector<64x1xi1> to vector<64x64xi1>
    %61 = vector.broadcast %58 : bf16 to vector<64x64xbf16>
    %62 = arith.select %60, %61, %55 : vector<64x64xi1>, vector<64x64xbf16>
    %63 = vector.extract_strided_slice %28 {offsets = [31, 0], sizes = [64, 64], strides = [1, 1]} : vector<128x64xbf16> to vector<64x64xbf16>
    %c0_i32_16 = arith.constant 0 : i32
    %64 = vector.broadcast %c0_i32_16 : i32 to vector<64x1xi32>
    %65 = arith.cmpi eq, %45, %64 : vector<64x1xi32>
    %c0_i32_17 = arith.constant 0 : i32
    %66 = arith.sitofp %c0_i32_17 : i32 to bf16
    %67 = vector.shape_cast %65 : vector<64x1xi1> to vector<64x1xi1>
    %68 = vector.broadcast %67 : vector<64x1xi1> to vector<64x64xi1>
    %69 = vector.broadcast %66 : bf16 to vector<64x64xbf16>
    %70 = arith.select %68, %69, %63 : vector<64x64xi1>, vector<64x64xbf16>
    %71 = vector.extract_strided_slice %28 {offsets = [32, 0], sizes = [64, 64], strides = [1, 1]} : vector<128x64xbf16> to vector<64x64xbf16>
    %72 = vector.extract_strided_slice %28 {offsets = [33, 0], sizes = [64, 64], strides = [1, 1]} : vector<128x64xbf16> to vector<64x64xbf16>
    %c15_i32_18 = arith.constant 15 : i32
    %73 = vector.broadcast %c15_i32_18 : i32 to vector<64x1xi32>
    %74 = arith.cmpi eq, %45, %73 : vector<64x1xi32>
    %c0_i32_19 = arith.constant 0 : i32
    %75 = arith.sitofp %c0_i32_19 : i32 to bf16
    %76 = vector.shape_cast %74 : vector<64x1xi1> to vector<64x1xi1>
    %77 = vector.broadcast %76 : vector<64x1xi1> to vector<64x64xi1>
    %78 = vector.broadcast %75 : bf16 to vector<64x64xbf16>
    %79 = arith.select %77, %78, %72 : vector<64x64xi1>, vector<64x64xbf16>
    %80 = vector.extract_strided_slice %28 {offsets = [47, 0], sizes = [64, 64], strides = [1, 1]} : vector<128x64xbf16> to vector<64x64xbf16>
    %c0_i32_20 = arith.constant 0 : i32
    %81 = vector.broadcast %c0_i32_20 : i32 to vector<64x1xi32>
    %82 = arith.cmpi eq, %45, %81 : vector<64x1xi32>
    %c0_i32_21 = arith.constant 0 : i32
    %83 = arith.sitofp %c0_i32_21 : i32 to bf16
    %84 = vector.shape_cast %82 : vector<64x1xi1> to vector<64x1xi1>
    %85 = vector.broadcast %84 : vector<64x1xi1> to vector<64x64xi1>
    %86 = vector.broadcast %83 : bf16 to vector<64x64xbf16>
    %87 = arith.select %85, %86, %80 : vector<64x64xi1>, vector<64x64xbf16>
    %88 = vector.extract_strided_slice %28 {offsets = [48, 0], sizes = [64, 64], strides = [1, 1]} : vector<128x64xbf16> to vector<64x64xbf16>
    %89 = vector.extract_strided_slice %28 {offsets = [49, 0], sizes = [64, 64], strides = [1, 1]} : vector<128x64xbf16> to vector<64x64xbf16>
    %c15_i32_22 = arith.constant 15 : i32
    %90 = vector.broadcast %c15_i32_22 : i32 to vector<64x1xi32>
    %91 = arith.cmpi eq, %45, %90 : vector<64x1xi32>
    %c0_i32_23 = arith.constant 0 : i32
    %92 = arith.sitofp %c0_i32_23 : i32 to bf16
    %93 = vector.shape_cast %91 : vector<64x1xi1> to vector<64x1xi1>
    %94 = vector.broadcast %93 : vector<64x1xi1> to vector<64x64xi1>
    %95 = vector.broadcast %92 : bf16 to vector<64x64xbf16>
    %96 = arith.select %94, %95, %89 : vector<64x64xi1>, vector<64x64xbf16>
    %97 = tpu.concatenate %53, %54, %62, %70, %71, %79, %87, %88, %96 in 1 : vector<64x64xbf16>, vector<64x64xbf16>, vector<64x64xbf16>, vector<64x64xbf16>, vector<64x64xbf16>, vector<64x64xbf16>, vector<64x64xbf16>, vector<64x64xbf16>, vector<64x64xbf16> -> vector<64x576xbf16>
    %c0_24 = arith.constant 0 : index
    %c0_25 = arith.constant 0 : index
    %98 = vector.load %arg6[%c0_24, %c0_25] : memref<576x8xbf16, #tpu.memory_space<vmem>>, vector<576x8xbf16>
    %cst_26 = arith.constant dense<0.000000e+00> : vector<64x8xf32>
    %99 = tpu.matmul %97, %98, %cst_26 {dimension_numbers = #tpu.dot_dimension_numbers<[1], [0], [0], [1], [0, 0, 1, 1], [], []>} : vector<64x576xbf16>, vector<576x8xbf16>, vector<64x8xf32> -> vector<64x8xf32>
    %c0_27 = arith.constant 0 : index
    %c0_28 = arith.constant 0 : index
    %100 = vector.load %arg7[%c0_27, %c0_28] : memref<1x8xf32, #tpu.memory_space<vmem>>, vector<1x8xf32>
    %101 = vector.broadcast %100 : vector<1x8xf32> to vector<64x8xf32>
    %102 = arith.addf %99, %101 : vector<64x8xf32>
    %c0_29 = arith.constant 0 : index
    %c0_30 = arith.constant 0 : index
    %103 = vector.load %arg3[%c0_29, %c0_30] : memref<64x8xf32, #tpu.memory_space<vmem>>, vector<64x8xf32>
    %104 = arith.addf %102, %103 : vector<64x8xf32>
    %105 = arith.negf %104 : vector<64x8xf32>
    %106 = math.exp %105 : vector<64x8xf32>
    %cst_31 = arith.constant 1.000000e+00 : f32
    %107 = vector.broadcast %cst_31 : f32 to vector<64x8xf32>
    %108 = arith.addf %107, %106 : vector<64x8xf32>
    %109 = arith.divf %107, %108 : vector<64x8xf32>
    %c0_32 = arith.constant 0 : index
    %c0_33 = arith.constant 0 : index
    %110 = vector.load %arg8[%c0_32, %c0_33] : memref<64x8xf32, #tpu.memory_space<vmem>>, vector<64x8xf32>
    tpu.vector_store %arg8[%c0_32, %c0_33], %109 {strides = array<i32>} : memref<64x8xf32, #tpu.memory_space<vmem>>, vector<64x8xf32>,
    return
  }
  func.func @transform_0(%arg0: i32) -> (i32, i32) {
    %c0_i32 = arith.constant 0 : i32
    %c0_i32_0 = arith.constant 0 : i32
    %c0_i32_1 = arith.constant 0 : i32
    return %c0_i32, %c0_i32_0 : i32, i32
  }
  func.func @transform_1(%arg0: i32) -> (i32, i32) {
    %c0_i32 = arith.constant 0 : i32
    %c0_i32_0 = arith.constant 0 : i32
    %c0_i32_1 = arith.constant 0 : i32
    return %c0_i32, %c0_i32_0 : i32, i32
  }
  func.func @transform_2(%arg0: i32) -> (i32, i32) {
    %c0_i32 = arith.constant 0 : i32
    %c0_i32_0 = arith.constant 0 : i32
    return %arg0, %c0_i32 : i32, i32
  }
  func.func @transform_3(%arg0: i32) -> (i32, i32) {
    %c0_i32 = arith.constant 0 : i32
    %c0_i32_0 = arith.constant 0 : i32
    %c0_i32_1 = arith.constant 0 : i32
    return %c0_i32, %c0_i32_0 : i32, i32
  }
  func.func @transform_4(%arg0: i32) -> (i32, i32) {
    %c0_i32 = arith.constant 0 : i32
    %c0_i32_0 = arith.constant 0 : i32
    %c0_i32_1 = arith.constant 0 : i32
    return %c0_i32, %c0_i32_0 : i32, i32
  }
  func.func @transform_5(%arg0: i32) -> (i32, i32) {
    %c0_i32 = arith.constant 0 : i32
    %c0_i32_0 = arith.constant 0 : i32
    %c0_i32_1 = arith.constant 0 : i32
    return %c0_i32, %c0_i32_0 : i32, i32
  }
  func.func @transform_6(%arg0: i32) -> (i32, i32) {
    %c0_i32 = arith.constant 0 : i32
    %c0_i32_0 = arith.constant 0 : i32
    %c0_i32_1 = arith.constant 0 : i32
    return %c0_i32, %c0_i32_0 : i32, i32
  }
  func.func @transform_7(%arg0: i32) -> (i32, i32) {
    %c0_i32 = arith.constant 0 : i32
    %c0_i32_0 = arith.constant 0 : i32
    return %arg0, %c0_i32 : i32, i32
  }
}

</mosaic_0001>

<bundles_post_ra>
// kernel: my_restormer_forward.3
= control target key start
LH: loop header
LB: loop body
LE: loop exit
PB: predicated region body
PF: predicated region fallthrough
CT: control target
= control target key end

     0   :  { %s920_s18 = smov 0   ;;  %s1062_s0 = inlined_call_operand.vmem [shape: bf16[256,144], index: 0, kind: input, shape index: {}]   ;;  %s1063_s1 = inlined_call_operand.vmem [shape: bf16[144,128], index: 1, kind: input, shape index: {}]   ;;  %s1064_s2 = inlined_call_operand.vmem [shape: f32[1,128], index: 2, kind: input, shape index: {}]   ;;  %s1065_s3 = inlined_call_operand.vmem [shape: bf16[128,256], index: 3, kind: input, shape index: {}]   ;;  %s1066_s4 = inlined_call_operand.vmem [shape: f32[1,256], index: 4, kind: input, shape index: {}]   ;;  %s1067_s5 = inlined_call_operand.vmem [shape: bf16[256,256], index: 5, kind: output, shape index: {}]  }
   0x1 LB: > { %s758_s19 = sadd.s32 4294967295, %s887_s18   ;;  %p762_p0 = scmp.ge.s32.totalorder %s887_s18, 1  ;;  %s887_s18 = sphi %s920_s18, %s15_s18  }
   0x2   : > { %p189_p1 = scmp.lt.s32.totalorder %s887_s18, 5 }
   0x4   : > { %p190_p2 = pnand %p762_p0, %p189_p1 }
   0x5   : > { %v836_v0 = vld [vmem:[%s1063_s1] sm:$0xff] (!%p190_p2)   ;;  %v889_v1 = vmov (!%p190_p2), 0   ;;  %s763_s22 = sshll.u32 (!%p190_p2), %s758_s19, 3  ;;  %v837_v2 = vld [vmem:[%s1063_s1 + $0x8] sm:$0xff] (!%p190_p2)   ;;  %v838_v3 = vld [vmem:[%s1063_s1 + $0x10] sm:$0xff] (!%p190_p2)   ;;  %vm357_vm0 = vcmask (!%p190_p2), 130048  }
   0x6   : > { %193 = sbr.rel (%p190_p2) target bundleno = 508 (0x1fc), region = 40  ;;  %370 = vmatprep.subr.bf16.mxu0 (!%p190_p2), %v889_v1  ;;  %587 = vmatprep.mubr.bf16.mxu1 (!%p190_p2), %v889_v1  ;;  %p220_p3 = scmp.lt.s32.totalorder (!%p190_p2), %s763_s22, 31  ;;  %v839_v4 = vld [vmem:[%s1063_s1 + $0x18] sm:$0xff] (!%p190_p2)   ;;  %v840_v6 = vld [vmem:[%s1063_s1 + $0x20] sm:$0xff] (!%p190_p2)   ;;  %v841_v10 = vld [vmem:[%s1063_s1 + $0x28] sm:$0xff] (!%p190_p2)  }
   0x7   : > { %371 = vmatpush1.bf16.msra.mxu0 (!%p190_p2), %v836_v0  ;;  %v857_v7 = vld [vmem:[%s1065_s3 + $0x4] ss:$8 sps:$4 sm:$0xff] (!%p190_p2)   ;;  %v859_v8 = vld [vmem:[%s1065_s3] ss:$8 sps:$4 sm:$0xff] (!%p190_p2)   ;;  %v860_v9 = vld [vmem:[%s1065_s3 + $0x14] ss:$8 sps:$4 sm:$0xff] (!%p190_p2)  }
   0x8   : > { %372 = vmatprep.subr.bf16.mxu0 (!%p190_p2), %v889_v1  ;;  %555 = vmatprep.subr.bf16.mxu1 (!%p190_p2), %v857_v7  ;;  %v862_v11 = vld [vmem:[%s1065_s3 + $0x10] ss:$8 sps:$4 sm:$0xff] (!%p190_p2)   ;;  %v863_v12 = vld [vmem:[%s1065_s3 + $0x24] ss:$8 sps:$4 sm:$0xff] (!%p190_p2)   ;;  %v865_v14 = vld [vmem:[%s1065_s3 + $0x20] ss:$8 sps:$4 sm:$0xff] (!%p190_p2)  }
   0x9   : > { %556 = vmatpush1.bf16.msra.mxu1 (!%p190_p2), %v859_v8  ;;  %v842_v13 = vld [vmem:[%s1063_s1 + $0x30] sm:$0xff] (!%p190_p2)   ;;  %v843_v16 = vld [vmem:[%s1063_s1 + $0x38] sm:$0xff] (!%p190_p2)   ;;  %v869_v18 = vld [vmem:[%s1065_s3 + $0x44] ss:$8 sps:$4 sm:$0xff] (!%p190_p2)   ;;  %v465_v8 = vlaneseq (!%p190_p2) }
   0xa   : > { %557 = vmatprep.subr.bf16.mxu1 (!%p190_p2), %v860_v9  ;;  %v866_v15 = vld [vmem:[%s1065_s3 + $0x34] ss:$8 sps:$4 sm:$0xff] (!%p190_p2)   ;;  %v868_v17 = vld [vmem:[%s1065_s3 + $0x30] ss:$8 sps:$4 sm:$0xff] (!%p190_p2)   ;;  %v844_v19 = vld [vmem:[%s1063_s1 + $0x40] sm:$0xff] (!%p190_p2)  }
   0xb   : > { %373 = vmatpush1.bf16.msra.mxu0 (!%p190_p2), %v837_v2  ;;  %v871_v20 = vld [vmem:[%s1065_s3 + $0x40] ss:$8 sps:$4 sm:$0xff] (!%p190_p2)   ;;  %v872_v21 = vld [vmem:[%s1065_s3 + $0x54] ss:$8 sps:$4 sm:$0xff] (!%p190_p2)   ;;  %v874_v24 = vld [vmem:[%s1065_s3 + $0x50] ss:$8 sps:$4 sm:$0xff] (!%p190_p2)  }
   0xc   : > { %374 = vmatprep.subr.bf16.mxu0 (!%p190_p2), %v889_v1  ;;  %v875_v30 = vld [vmem:[%s1065_s3 + $0x64] ss:$8 sps:$4 sm:$0xff] (!%p190_p2)   ;;  %v877_v31 = vld [vmem:[%s1065_s3 + $0x60] ss:$8 sps:$4 sm:$0xff] (!%p190_p2)   ;;  %v878_v32 = vld [vmem:[%s1065_s3 + $0x74] ss:$8 sps:$4 sm:$0xff] (!%p190_p2)  }
   0xd   : > { %s1069_s22 = smov (!%p220_p3, %s763_s22), 31  ;;  %558 = vmatpush1.bf16.msra.mxu1 %v862_v11  ;;  %v880_v33 = vld [vmem:[%s1065_s3 + $0x70] ss:$8 sps:$4 sm:$0xff]   ;;  %v769_v34 = vld [vmem:[%s1064_s2] ss:$0 sm:$0xff]  ;;  %v466_v9 = vshrl.u32 %v465_v8, 7 }
   0xe   : > { %s817_s27 = sshll.u32 %s1069_s22, 3  ;;  %559 = vmatprep.subr.bf16.mxu1 %v863_v12  ;;  %v463_v11 = vld [vmem:[%s1066_s4] sm:$0x3] }
   0xf   : > { %s949_s30 = scalar_lea.vmem %s1062_s0, %s817_s27  ;;  %375 = vmatpush1.bf16.msra.mxu0 %v838_v3  ;;  %v471_v12 = vsub.s32 1, %v466_v9  ;;  %s1049_s13 = scalar_lea.vmem %s1067_s5, %s817_s27 }
  0x10   : > { %v847_v5 = vld [vmem:[%s949_s30 + $0x4] ss:$8 sps:$4 sm:$0xff]   ;;  %376 = vmatprep.subr.bf16.mxu0 %v889_v1  ;;  %v845_v22 = vld [vmem:[%s949_s30] ss:$8 sps:$4 sm:$0xff]   ;;  %v848_v23 = vld [vmem:[%s949_s30 + $0x14] ss:$8 sps:$4 sm:$0xff]  }
  0x11   : > { %787 = vmatprep.mubr.msk.bf16.mxu0 %vm357_vm0, %v847_v5  ;;  %560 = vmatpush1.bf16.msra.mxu1 %v865_v14  ;;  %v850_v25 = vld [vmem:[%s949_s30 + $0x10] ss:$8 sps:$4 sm:$0xff]   ;;  %v851_v26 = vld [vmem:[%s949_s30 + $0x24] ss:$8 sps:$4 sm:$0xff]   ;;  %v853_v27 = vld [vmem:[%s949_s30 + $0x20] ss:$8 sps:$4 sm:$0xff]   ;;  %v472_v14 = vrot.slane %v463_v11, %v471_v12 }
  0x12   : > { %561 = vmatprep.subr.bf16.mxu1 %v866_v15  ;;  %v854_v28 = vld [vmem:[%s949_s30 + $0x34] ss:$8 sps:$4 sm:$0xff]   ;;  %v856_v29 = vld [vmem:[%s949_s30 + $0x30] ss:$8 sps:$4 sm:$0xff]  }
  0x13   : > { %377 = vmatpush1.bf16.msra.mxu0 %v839_v4 }
  0x14   : > { %378 = vmatprep.subr.bf16.mxu0 %v889_v1 }
  0x15   : > { %562 = vmatpush1.bf16.msra.mxu1 %v868_v17 }
  0x16   : > { %563 = vmatprep.subr.bf16.mxu1 %v869_v18 }
  0x17   : > { %379 = vmatpush1.bf16.msra.mxu0 %v840_v6 }
  0x18   : > { %380 = vmatprep.subr.bf16.mxu0 %v889_v1 }
  0x19   : > { %564 = vmatpush1.bf16.msra.mxu1 %v871_v20 }
  0x1a   : > { %565 = vmatprep.subr.bf16.mxu1 %v872_v21 }
  0x1b   : > { %381 = vmatpush1.bf16.msra.mxu0 %v841_v10  ;;  %v467_v10 = vsub.s32 0, %v466_v9 }
  0x1c   : > { %382 = vmatprep.subr.bf16.mxu0 %v889_v1 }
  0x1d   : > { %566 = vmatpush1.bf16.msra.mxu1 %v874_v24 }
  0x1e   : > { %567 = vmatprep.subr.bf16.mxu1 %v875_v30 }
  0x1f   : > { %383 = vmatpush1.bf16.msra.mxu0 %v842_v13  ;;  %v468_v13 = vrot.slane %v463_v11, %v467_v10 }
  0x20   : > { %384 = vmatprep.subr.bf16.mxu0 %v889_v1 }
  0x21   : > { %568 = vmatpush1.bf16.msra.mxu1 %v877_v31 }
  0x22   : > { %569 = vmatprep.subr.bf16.mxu1 %v878_v32 }
  0x23   : > { %385 = vmatpush1.bf16.msra.mxu0 %v843_v16 }
  0x24   : > { %386 = vmatprep.subr.bf16.mxu0 %v889_v1 }
  0x25   : > { %570 = vmatpush1.bf16.msra.mxu1 %v880_v33 }
  0x27   : > { %387 = vmatpush1.bf16.msra.mxu0 %v844_v19 }
  0x2a   : > { %403 = vmatmul.mubr.bf16.vlgmr.msra.gmra.mrb[0].mxu0 %v845_v22 }
  0x2b   : > { %788 = vmatprep.mubr.msk.bf16.mxu0 %vm357_vm0, %v848_v23 }
  0x32   : > { %411 = vmatmul.mubr.bf16.gmra.mrb[4].mxu0 %v850_v25 }
  0x33   : > { %789 = vmatprep.mubr.msk.bf16.mxu0 %vm357_vm0, %v851_v26 }
  0x3a   : > { %419 = vmatmul.mubr.bf16.gmra.mrb[8].mxu0 %v853_v27 }
  0x3b   : > { %790 = vmatprep.mubr.msk.bf16.mxu0 %vm357_vm0, %v854_v28 }
  0x42   : > { %427 = vmatmul.mubr.bf16.gmra.mrb[12].mxu0 %v856_v29 }
  0xfd   : > { %v404_v35 = vpop.f32.mrb[0].mxu0 }
  0xfe   : > { %v405_v36 = vadd.f32 %v769_v34, %v404_v35  ;;  %v406_v37 = vpop.f32.mrb[1].mxu0 }
  0xff   : > { %v407_v38 = vpop.f32.mrb[2].mxu0 }
 0x100   : > { %v408_v39 = vadd.f32 %v769_v34, %v407_v38  ;;  %v409_v40 = vpop.f32.mrb[3].mxu0  ;;  %v435_v41 = vmax.f32 %v405_v36, 0.0 }
 0x102   : > { %v436_v42 = vmax.f32 %v408_v39, 0.0 }
 0x104   : > { %v443_v43 = vpack.c.bf16 %v436_v42, %v435_v41 }
 0x105   : > { %v412_v44 = vpop.f32.mrb[4].mxu0 }
 0x106   : > { %v413_v45 = vadd.f32 %v769_v34, %v412_v44  ;;  %v414_v46 = vpop.f32.mrb[5].mxu0  ;;  %588 = vmatmul.mubr.bf16.vlgmr.msra.gmra.mrb[0].mxu1 %v443_v43 }
 0x107   : > { %v415_v47 = vpop.f32.mrb[6].mxu0  ;;  %597 = vmatprep.mubr.bf16.mxu1 %v889_v1 }
 0x108   : > { %v416_v48 = vadd.f32 %v769_v34, %v415_v47  ;;  %v417_v49 = vpop.f32.mrb[7].mxu0  ;;  %v437_v50 = vmax.f32 %v413_v45, 0.0 }
 0x10a   : > { %v438_v51 = vmax.f32 %v416_v48, 0.0 }
 0x10c   : > { %v444_v52 = vpack.c.bf16 %v438_v51, %v437_v50 }
 0x10d   : > { %v420_v53 = vpop.f32.mrb[8].mxu0 }
 0x10e   : > { %v421_v54 = vadd.f32 %v769_v34, %v420_v53  ;;  %v422_v55 = vpop.f32.mrb[9].mxu0  ;;  %598 = vmatmul.mubr.bf16.gmra.mrb[4].mxu1 %v444_v52 }
 0x10f   : > { %v423_v56 = vpop.f32.mrb[10].mxu0  ;;  %607 = vmatprep.mubr.bf16.mxu1 %v889_v1 }
 0x110   : > { %v424_v57 = vadd.f32 %v769_v34, %v423_v56  ;;  %v425_v58 = vpop.f32.mrb[11].mxu0  ;;  %v439_v59 = vmax.f32 %v421_v54, 0.0 }
 0x112   : > { %v440_v60 = vmax.f32 %v424_v57, 0.0 }
 0x114   : > { %v445_v61 = vpack.c.bf16 %v440_v60, %v439_v59 }
 0x115   : > { %v428_v62 = vpop.f32.mrb[12].mxu0 }
 0x116   : > { %v429_v63 = vadd.f32 %v769_v34, %v428_v62  ;;  %v430_v0 = vpop.f32.mrb[13].mxu0  ;;  %608 = vmatmul.mubr.bf16.gmra.mrb[8].mxu1 %v445_v61 }
 0x117   : > { %v431_v2 = vpop.f32.mrb[14].mxu0  ;;  %617 = vmatprep.mubr.bf16.mxu1 %v889_v1 }
 0x118   : > { %v432_v3 = vadd.f32 %v769_v34, %v431_v2  ;;  %v433_v4 = vpop.f32.mrb[15].mxu0  ;;  %v441_v5 = vmax.f32 %v429_v63, 0.0 }
 0x11a   : > { %v442_v6 = vmax.f32 %v432_v3, 0.0 }
 0x11c   : > { %v446_v7 = vpack.c.bf16 %v442_v6, %v441_v5 }
 0x11e   : > { %618 = vmatmul.mubr.bf16.gmra.mrb[12].mxu1 %v446_v7 }
 0x1d9   : > { %v589_v15 = vpop.f32.mrb[0].mxu1 }
 0x1da   : > { %v590_v16 = vadd.f32 %v589_v15, %v468_v13  ;;  %v591_v1 = vpop.f32.mrb[1].mxu1 }
 0x1db   : > { %v592_v17 = vadd.f32 %v591_v1, %v472_v14  ;;  %v593_v18 = vpop.f32.mrb[2].mxu1 }
 0x1dc   : > { %v628_v19 = vmax.f32 %v590_v16, 0.0  ;;  %v594_v20 = vadd.f32 %v593_v18, %v468_v13  ;;  %v595_v21 = vpop.f32.mrb[3].mxu1 }
 0x1dd   : > { %v629_v22 = vmax.f32 %v592_v17, 0.0  ;;  %v596_v23 = vadd.f32 %v595_v21, %v472_v14 }
 0x1de   : > { %v630_v24 = vmax.f32 %v594_v20, 0.0 }
 0x1df   : > { %v819_v25 = vpack.c.bf16 %v629_v22, %v628_v19  ;;  %v631_v26 = vmax.f32 %v596_v23, 0.0 }
 0x1e1   : > { %692 = vst [vmem:[%s1049_s13] sm:$0xff] %v819_v25  ;;  %v820_v27 = vpack.c.bf16 %v631_v26, %v630_v24  ;;  %v599_v28 = vpop.f32.mrb[4].mxu1 }
 0x1e2   : > { %v600_v29 = vadd.f32 %v599_v28, %v468_v13  ;;  %v601_v30 = vpop.f32.mrb[5].mxu1 }
 0x1e3   : > { %693 = vst [vmem:[%s1049_s13 + $0x8] sm:$0xff] %v820_v27  ;;  %v602_v31 = vadd.f32 %v601_v30, %v472_v14  ;;  %v603_v32 = vpop.f32.mrb[6].mxu1 }
 0x1e4   : > { %v632_v33 = vmax.f32 %v600_v29, 0.0  ;;  %v604_v34 = vadd.f32 %v603_v32, %v468_v13  ;;  %v605_v35 = vpop.f32.mrb[7].mxu1 }
 0x1e5   : > { %v633_v36 = vmax.f32 %v602_v31, 0.0  ;;  %v606_v37 = vadd.f32 %v605_v35, %v472_v14 }
 0x1e6   : > { %v634_v38 = vmax.f32 %v604_v34, 0.0 }
 0x1e7   : > { %v821_v39 = vpack.c.bf16 %v633_v36, %v632_v33  ;;  %v635_v40 = vmax.f32 %v606_v37, 0.0 }
 0x1e9   : > { %694 = vst [vmem:[%s1049_s13 + $0x10] sm:$0xff] %v821_v39  ;;  %v822_v41 = vpack.c.bf16 %v635_v40, %v634_v38  ;;  %v609_v42 = vpop.f32.mrb[8].mxu1 }
 0x1ea   : > { %v610_v43 = vadd.f32 %v609_v42, %v468_v13  ;;  %v611_v44 = vpop.f32.mrb[9].mxu1 }
 0x1eb   : > { %695 = vst [vmem:[%s1049_s13 + $0x18] sm:$0xff] %v822_v41  ;;  %v612_v45 = vadd.f32 %v611_v44, %v472_v14  ;;  %v613_v46 = vpop.f32.mrb[10].mxu1 }
 0x1ec   : > { %v636_v47 = vmax.f32 %v610_v43, 0.0  ;;  %v614_v48 = vadd.f32 %v613_v46, %v468_v13  ;;  %v615_v49 = vpop.f32.mrb[11].mxu1 }
 0x1ed   : > { %v637_v50 = vmax.f32 %v612_v45, 0.0  ;;  %v616_v51 = vadd.f32 %v615_v49, %v472_v14 }
 0x1ee   : > { %v638_v52 = vmax.f32 %v614_v48, 0.0 }
 0x1ef   : > { %v823_v53 = vpack.c.bf16 %v637_v50, %v636_v47  ;;  %v639_v54 = vmax.f32 %v616_v51, 0.0 }
 0x1f1   : > { %696 = vst [vmem:[%s1049_s13 + $0x20] sm:$0xff] %v823_v53  ;;  %v824_v55 = vpack.c.bf16 %v639_v54, %v638_v52  ;;  %v619_v56 = vpop.f32.mrb[12].mxu1 }
 0x1f2   : > { %v620_v57 = vadd.f32 %v619_v56, %v468_v13  ;;  %v621_v58 = vpop.f32.mrb[13].mxu1 }
 0x1f3   : > { %697 = vst [vmem:[%s1049_s13 + $0x28] sm:$0xff] %v824_v55  ;;  %v622_v59 = vadd.f32 %v621_v58, %v472_v14  ;;  %v623_v60 = vpop.f32.mrb[14].mxu1 }
 0x1f4   : > { %v640_v61 = vmax.f32 %v620_v57, 0.0  ;;  %v624_v62 = vadd.f32 %v623_v60, %v468_v13  ;;  %v625_v63 = vpop.f32.mrb[15].mxu1 }
 0x1f5   : > { %v641_v0 = vmax.f32 %v622_v59, 0.0  ;;  %v626_v2 = vadd.f32 %v625_v63, %v472_v14 }
 0x1f6   : > { %v642_v3 = vmax.f32 %v624_v62, 0.0 }
 0x1f7   : > { %v825_v4 = vpack.c.bf16 %v641_v0, %v640_v61  ;;  %v643_v5 = vmax.f32 %v626_v2, 0.0 }
 0x1f9   : > { %698 = vst [vmem:[%s1049_s13 + $0x30] sm:$0xff] %v825_v4  ;;  %v826_v6 = vpack.c.bf16 %v643_v5, %v642_v3 }
 0x1fb   : > { %699 = vst [vmem:[%s1049_s13 + $0x38] sm:$0xff] %v826_v6 }
 0x1fc PF: > { %s15_s18 = sadd.s32 1, %s887_s18  }
 0x1fd   : > { %p12_p4 = scmp.ge.s32.totalorder %s15_s18, 6  }
 0x1ff   :  { %14 = sbr.rel (!%p12_p4) target bundleno = 1 (0x1), region = 70 }

// kernel: my_restormer_forward.4
= control target key start
LH: loop header
LB: loop body
LE: loop exit
PB: predicated region body
PF: predicated region fallthrough
CT: control target
= control target key end

     0   :  { %s1473_s21 = smov 0   ;;  %s1748_s0 = inlined_call_operand.vmem [shape: bf16[256,256], index: 0, kind: input, shape index: {}]   ;;  %s1749_s1 = inlined_call_operand.vmem [shape: bf16[256,256], index: 1, kind: input, shape index: {}]   ;;  %s1750_s2 = inlined_call_operand.vmem [shape: bf16[256,128], index: 2, kind: input, shape index: {}]   ;;  %s1751_s3 = inlined_call_operand.vmem [shape: f32[1,128], index: 3, kind: input, shape index: {}]   ;;  %s1752_s4 = inlined_call_operand.vmem [shape: bf16[128,128], index: 4, kind: input, shape index: {}]   ;;  %s1753_s5 = inlined_call_operand.vmem [shape: f32[1,128], index: 5, kind: input, shape index: {}]   ;;  %s1754_s6 = inlined_call_operand.vmem [shape: bf16[256,128], index: 6, kind: output, shape index: {}]  }
   0x1 LB: > { %s1104_s22 = sadd.s32 4294967295, %s1436_s21   ;;  %p1108_p0 = scmp.ge.s32.totalorder %s1436_s21, 1  ;;  %s1436_s21 = sphi %s1473_s21, %s16_s21  }
   0x2   : > { %p214_p1 = scmp.lt.s32.totalorder %s1436_s21, 5 }
   0x4   : > { %p215_p2 = pnand %p1108_p0, %p214_p1 }
   0x5   : > { %v1314_v0 = vld [vmem:[%s1749_s1 + $0x4] ss:$8 sps:$4 sm:$0xff] (!%p215_p2)   ;;  %v1316_v1 = vld [vmem:[%s1749_s1] ss:$8 sps:$4 sm:$0xff] (!%p215_p2)   ;;  %v1317_v2 = vld [vmem:[%s1749_s1 + $0x14] ss:$8 sps:$4 sm:$0xff] (!%p215_p2)  }
   0x6   : > { %218 = sbr.rel (%p215_p2) target bundleno = 788 (0x314), region = 44  ;;  %499 = vmatprep.subr.bf16.mxu0 (!%p215_p2), %v1314_v0  ;;  %v1319_v3 = vld [vmem:[%s1749_s1 + $0x10] ss:$8 sps:$4 sm:$0xff] (!%p215_p2)   ;;  %v1320_v4 = vld [vmem:[%s1749_s1 + $0x24] ss:$8 sps:$4 sm:$0xff] (!%p215_p2)   ;;  %s1109_s9 = sshll.u32 (!%p215_p2), %s1104_s22, 3 }
   0x7   : > { %500 = vmatpush1.bf16.msra.mxu0 (!%p215_p2), %v1316_v1  ;;  %v1322_v5 = vld [vmem:[%s1749_s1 + $0x20] ss:$8 sps:$4 sm:$0xff] (!%p215_p2)   ;;  %v1323_v6 = vld [vmem:[%s1749_s1 + $0x34] ss:$8 sps:$4 sm:$0xff] (!%p215_p2)   ;;  %p246_p3 = scmp.lt.s32.totalorder (!%p215_p2), %s1109_s9, 31 }
   0x8   : > { %501 = vmatprep.subr.bf16.mxu0 (!%p215_p2), %v1317_v2  ;;  %v1325_v7 = vld [vmem:[%s1749_s1 + $0x30] ss:$8 sps:$4 sm:$0xff] (!%p215_p2)   ;;  %v1326_v8 = vld [vmem:[%s1749_s1 + $0x44] ss:$8 sps:$4 sm:$0xff] (!%p215_p2)   ;;  %v1328_v9 = vld [vmem:[%s1749_s1 + $0x40] ss:$8 sps:$4 sm:$0xff] (!%p215_p2)  }
   0x9   : > { %v1329_v10 = vld [vmem:[%s1749_s1 + $0x54] ss:$8 sps:$4 sm:$0xff] (!%p215_p2)   ;;  %v1331_v11 = vld [vmem:[%s1749_s1 + $0x50] ss:$8 sps:$4 sm:$0xff] (!%p215_p2)   ;;  %v1332_v12 = vld [vmem:[%s1749_s1 + $0x64] ss:$8 sps:$4 sm:$0xff] (!%p215_p2)  }
   0xa   : > { %v1334_v14 = vld [vmem:[%s1749_s1 + $0x60] ss:$8 sps:$4 sm:$0xff] (!%p215_p2)   ;;  %v1335_v15 = vld [vmem:[%s1749_s1 + $0x74] ss:$8 sps:$4 sm:$0xff] (!%p215_p2)   ;;  %v1337_v16 = vld [vmem:[%s1749_s1 + $0x70] ss:$8 sps:$4 sm:$0xff] (!%p215_p2)  }
   0xb   : > { %502 = vmatpush1.bf16.msra.mxu0 (!%p215_p2), %v1319_v3  ;;  %v1338_v17 = vld [vmem:[%s1749_s1 + $0x84] ss:$8 sps:$4 sm:$0xff] (!%p215_p2)   ;;  %v1340_v20 = vld [vmem:[%s1749_s1 + $0x80] ss:$8 sps:$4 sm:$0xff] (!%p215_p2)   ;;  %v1378_v23 = vld [vmem:[%s1750_s2 + $0x50] sm:$0xff] (!%p215_p2)  }
   0xc   : > { %503 = vmatprep.subr.bf16.mxu0 (!%p215_p2), %v1320_v4  ;;  %v1374_v18 = vld [vmem:[%s1750_s2 + $0x40] sm:$0xff] (!%p215_p2)   ;;  %v1376_v21 = vld [vmem:[%s1750_s2 + $0x48] sm:$0xff] (!%p215_p2)   ;;  %v1341_v24 = vld [vmem:[%s1749_s1 + $0x94] ss:$8 sps:$4 sm:$0xff] (!%p215_p2)  }
   0xd   : > { %s1756_s9 = smov (!%p246_p3, %s1109_s9), 31  ;;  %v1375_v19 = vld [vmem:[%s1750_s2] sm:$0xff]   ;;  %1230 = vmatprep.subr.bf16.mxu1 %v1374_v18  ;;  %v1377_v22 = vld [vmem:[%s1750_s2 + $0x8] sm:$0xff]   ;;  %v1343_v25 = vld [vmem:[%s1749_s1 + $0x90] ss:$8 sps:$4 sm:$0xff]  }
   0xe   : > { %s1198_s23 = sshll.u32 %s1756_s9, 3  ;;  %1231 = vmatpush3.bf16.msra.mxu1 %v1375_v19  ;;  %v1379_v26 = vld [vmem:[%s1750_s2 + $0x10] sm:$0xff]   ;;  %v1380_v27 = vld [vmem:[%s1750_s2 + $0x58] sm:$0xff]   ;;  %v1344_v28 = vld [vmem:[%s1749_s1 + $0xa4] ss:$8 sps:$4 sm:$0xff]   ;;  %s1113_s13 = sshll.u32 %s1756_s9, 2 }
   0xf   : > { %504 = vmatpush1.bf16.msra.mxu0 %v1322_v5  ;;  %s1523_s28 = scalar_lea.vmem %s1748_s0, %s1198_s23  ;;  %1232 = vmatprep.subr.bf16.mxu1 %v1376_v21  ;;  %v1346_v29 = vld [vmem:[%s1749_s1 + $0xa0] ss:$8 sps:$4 sm:$0xff]   ;;  %v1347_v30 = vld [vmem:[%s1749_s1 + $0xb4] ss:$8 sps:$4 sm:$0xff]   ;;  %v1349_v34 = vld [vmem:[%s1749_s1 + $0xb0] ss:$8 sps:$4 sm:$0xff]   ;;  %s1731_s16 = scalar_lea.vmem %s1754_s6, %s1113_s13 }
  0x10   : > { %505 = vmatprep.subr.bf16.mxu0 %v1323_v6  ;;  %v1364_v13 = vld [vmem:[%s1523_s28 + $0x4] ss:$8 sps:$4 sm:$0xff]   ;;  %v1381_v31 = vld [vmem:[%s1750_s2 + $0x18] sm:$0xff]   ;;  %v1352_v38 = vld [vmem:[%s1749_s1 + $0xc0] ss:$8 sps:$4 sm:$0xff]  }
  0x11   : > { %531 = vmatprep.mubr.bf16.mxu0 %v1364_v13  ;;  %v1382_v32 = vld [vmem:[%s1750_s2 + $0x60] sm:$0xff]   ;;  %v1384_v35 = vld [vmem:[%s1750_s2 + $0x68] sm:$0xff]   ;;  %v1386_v39 = vld [vmem:[%s1750_s2 + $0x70] sm:$0xff]  }
  0x12   : > { %1233 = vmatpush3.bf16.msra.mxu1 %v1377_v22  ;;  %v1383_v33 = vld [vmem:[%s1750_s2 + $0x20] sm:$0xff]   ;;  %v1385_v37 = vld [vmem:[%s1750_s2 + $0x28] sm:$0xff]   ;;  %v1353_v40 = vld [vmem:[%s1749_s1 + $0xd4] ss:$8 sps:$4 sm:$0xff]  }
  0x13   : > { %506 = vmatpush1.bf16.msra.mxu0 %v1325_v7  ;;  %1234 = vmatprep.subr.bf16.mxu1 %v1378_v23  ;;  %v1350_v36 = vld [vmem:[%s1749_s1 + $0xc4] ss:$8 sps:$4 sm:$0xff]   ;;  %v1355_v41 = vld [vmem:[%s1749_s1 + $0xd0] ss:$8 sps:$4 sm:$0xff]   ;;  %v1358_v43 = vld [vmem:[%s1749_s1 + $0xe0] ss:$8 sps:$4 sm:$0xff]  }
  0x14   : > { %507 = vmatprep.subr.bf16.mxu0 %v1326_v8  ;;  %v1356_v42 = vld [vmem:[%s1749_s1 + $0xe4] ss:$8 sps:$4 sm:$0xff]   ;;  %v1359_v44 = vld [vmem:[%s1749_s1 + $0xf4] ss:$8 sps:$4 sm:$0xff]   ;;  %v1361_v45 = vld [vmem:[%s1749_s1 + $0xf0] ss:$8 sps:$4 sm:$0xff]  }
  0x15   : > { %v1362_v46 = vld [vmem:[%s1523_s28] ss:$8 sps:$4 sm:$0xff]   ;;  %v1365_v47 = vld [vmem:[%s1523_s28 + $0x14] ss:$8 sps:$4 sm:$0xff]   ;;  %v1367_v48 = vld [vmem:[%s1523_s28 + $0x10] ss:$8 sps:$4 sm:$0xff]  }
  0x16   : > { %1235 = vmatpush3.bf16.msra.mxu1 %v1379_v26  ;;  %v1368_v49 = vld [vmem:[%s1523_s28 + $0x24] ss:$8 sps:$4 sm:$0xff]   ;;  %v1370_v50 = vld [vmem:[%s1523_s28 + $0x20] ss:$8 sps:$4 sm:$0xff]   ;;  %v1371_v51 = vld [vmem:[%s1523_s28 + $0x34] ss:$8 sps:$4 sm:$0xff]  }
  0x17   : > { %508 = vmatpush1.bf16.msra.mxu0 %v1328_v9  ;;  %1236 = vmatprep.subr.bf16.mxu1 %v1380_v27  ;;  %v1373_v52 = vld [vmem:[%s1523_s28 + $0x30] ss:$8 sps:$4 sm:$0xff]   ;;  %v1390_v56 = vld [vmem:[%s1752_s4] sm:$0xff]   ;;  %v1391_v63 = vld [vmem:[%s1752_s4 + $0x8] sm:$0xff]  }
  0x18   : > { %509 = vmatprep.subr.bf16.mxu0 %v1329_v10  ;;  %v1387_v53 = vld [vmem:[%s1750_s2 + $0x30] sm:$0xff]   ;;  %v1388_v54 = vld [vmem:[%s1750_s2 + $0x78] sm:$0xff]   ;;  %v1395_v21 = vld [vmem:[%s1752_s4 + $0x28] sm:$0xff]  }
  0x19   : > { %v1389_v55 = vld [vmem:[%s1750_s2 + $0x38] sm:$0xff]   ;;  %v1392_v2 = vld [vmem:[%s1752_s4 + $0x10] sm:$0xff]  }
  0x1a   : > { %1237 = vmatpush3.bf16.msra.mxu1 %v1381_v31  ;;  %v1393_v19 = vld [vmem:[%s1752_s4 + $0x18] sm:$0xff]   ;;  %v1396_v22 = vld [vmem:[%s1752_s4 + $0x30] sm:$0xff]  }
  0x1b   : > { %510 = vmatpush1.bf16.msra.mxu0 %v1331_v11  ;;  %1238 = vmatprep.subr.bf16.mxu1 %v1382_v32  ;;  %v1397_v23 = vld [vmem:[%s1752_s4 + $0x38] sm:$0xff]  }
  0x1c   : > { %511 = vmatprep.subr.bf16.mxu0 %v1332_v12 }
  0x1e   : > { %1239 = vmatpush3.bf16.msra.mxu1 %v1383_v33 }
  0x1f   : > { %512 = vmatpush1.bf16.msra.mxu0 %v1334_v14  ;;  %1240 = vmatprep.subr.bf16.mxu1 %v1384_v35 }
  0x20   : > { %513 = vmatprep.subr.bf16.mxu0 %v1335_v15 }
  0x22   : > { %1241 = vmatpush3.bf16.msra.mxu1 %v1385_v37 }
  0x23   : > { %514 = vmatpush1.bf16.msra.mxu0 %v1337_v16  ;;  %1242 = vmatprep.subr.bf16.mxu1 %v1386_v39 }
  0x24   : > { %515 = vmatprep.subr.bf16.mxu0 %v1338_v17 }
  0x26   : > { %1243 = vmatpush3.bf16.msra.mxu1 %v1387_v53 }
  0x27   : > { %516 = vmatpush1.bf16.msra.mxu0 %v1340_v20  ;;  %1244 = vmatprep.subr.bf16.mxu1 %v1388_v54  ;;  %v1394_v20 = vld [vmem:[%s1752_s4 + $0x20] sm:$0xff]  }
  0x28   : > { %517 = vmatprep.subr.bf16.mxu0 %v1341_v24 }
  0x2a   : > { %1245 = vmatpush3.bf16.msra.mxu1 %v1389_v55 }
  0x2b   : > { %518 = vmatpush1.bf16.msra.mxu0 %v1343_v25  ;;  %1282 = vmatprep.subr.bf16.mxu1 %v1390_v56  ;;  %v1154_v25 = vld [vmem:[%s1751_s3] ss:$0 sm:$0xff] }
  0x2c   : > { %519 = vmatprep.subr.bf16.mxu0 %v1344_v28 }
  0x2f   : > { %520 = vmatpush1.bf16.msra.mxu0 %v1346_v29 }
  0x30   : > { %521 = vmatprep.subr.bf16.mxu0 %v1347_v30 }
  0x33   : > { %522 = vmatpush1.bf16.msra.mxu0 %v1349_v34 }
  0x34   : > { %523 = vmatprep.subr.bf16.mxu0 %v1350_v36 }
  0x37   : > { %524 = vmatpush1.bf16.msra.mxu0 %v1352_v38 }
  0x38   : > { %525 = vmatprep.subr.bf16.mxu0 %v1353_v40 }
  0x3b   : > { %526 = vmatpush1.bf16.msra.mxu0 %v1355_v41 }
  0x3c   : > { %527 = vmatprep.subr.bf16.mxu0 %v1356_v42 }
  0x3f   : > { %528 = vmatpush1.bf16.msra.mxu0 %v1358_v43 }
  0x40   : > { %529 = vmatprep.subr.bf16.mxu0 %v1359_v44 }
  0x43   : > { %530 = vmatpush1.bf16.msra.mxu0 %v1361_v45 }
  0x46   : > { %532 = vmatmul.mubr.bf16.vlgmr.msra.gmra.mrb[0].mxu0 %v1362_v46 }
  0x47   : > { %541 = vmatprep.mubr.bf16.mxu0 %v1365_v47 }
  0x4e   : > { %542 = vmatmul.mubr.bf16.gmra.mrb[4].mxu0 %v1367_v48 }
  0x4f   : > { %551 = vmatprep.mubr.bf16.mxu0 %v1368_v49 }
  0x56   : > { %552 = vmatmul.mubr.bf16.gmra.mrb[8].mxu0 %v1370_v50 }
  0x57   : > { %561 = vmatprep.mubr.bf16.mxu0 %v1371_v51 }
  0x5e   : > { %562 = vmatmul.mubr.bf16.gmra.mrb[12].mxu0 %v1373_v52 }
 0x119   : > { %v1644_v57 = vpop.f32.mrb[0].mxu0 }
 0x11a   : > { %v1646_v58 = vpop.f32.mrb[1].mxu0 }
 0x11b   : > { %v1648_v59 = vpop.f32.mrb[2].mxu0 }
 0x11c   : > { %v572_v60 = vpack.c.bf16 %v1648_v59, %v1644_v57  ;;  %v1652_v61 = vpop.f32.mrb[3].mxu0 }
 0x11d   : > { %v573_v62 = vpack.c.bf16 %v1652_v61, %v1646_v58 }
 0x11f   : > { %747 = vmatprep.mubr.bf16.mxu1 %v573_v62 }
 0x120   : > { %748 = vmatmul.mubr.bf16.vlgmr.msra.gmra.mrb[0].mxu1 %v572_v60 }
 0x121   : > { %v1659_v0 = vpop.f32.mrb[4].mxu0  ;;  %1283 = vmatpush3.bf16.msra.mxu1 %v1390_v56 }
 0x122   : > { %v1661_v1 = vpop.f32.mrb[5].mxu0  ;;  %1284 = vmatprep.subr.bf16.mxu1 %v1391_v63 }
 0x123   : > { %v1666_v3 = vpop.f32.mrb[6].mxu0 }
 0x124   : > { %v574_v4 = vpack.c.bf16 %v1666_v3, %v1659_v0  ;;  %v1670_v5 = vpop.f32.mrb[7].mxu0 }
 0x125   : > { %v575_v6 = vpack.c.bf16 %v1670_v5, %v1661_v1  ;;  %1285 = vmatpush3.bf16.msra.mxu1 %v1391_v63 }
 0x126   : > { %1286 = vmatprep.subr.bf16.mxu1 %v1392_v2 }
 0x127   : > { %755 = vmatprep.mubr.bf16.mxu1 %v575_v6 }
 0x128   : > { %756 = vmatmul.mubr.bf16.gmra.mrb[4].mxu1 %v574_v4 }
 0x129   : > { %v1674_v7 = vpop.f32.mrb[8].mxu0  ;;  %1287 = vmatpush3.bf16.msra.mxu1 %v1392_v2 }
 0x12a   : > { %v1676_v8 = vpop.f32.mrb[9].mxu0  ;;  %1288 = vmatprep.subr.bf16.mxu1 %v1393_v19 }
 0x12b   : > { %v1678_v9 = vpop.f32.mrb[10].mxu0 }
 0x12c   : > { %v576_v10 = vpack.c.bf16 %v1678_v9, %v1674_v7  ;;  %v1682_v11 = vpop.f32.mrb[11].mxu0 }
 0x12d   : > { %v577_v12 = vpack.c.bf16 %v1682_v11, %v1676_v8  ;;  %1289 = vmatpush3.bf16.msra.mxu1 %v1393_v19 }
 0x12e   : > { %1290 = vmatprep.subr.bf16.mxu1 %v1394_v20 }
 0x12f   : > { %763 = vmatprep.mubr.bf16.mxu1 %v577_v12 }
 0x130   : > { %764 = vmatmul.mubr.bf16.gmra.mrb[8].mxu1 %v576_v10 }
 0x131   : > { %v1686_v13 = vpop.f32.mrb[12].mxu0  ;;  %1291 = vmatpush3.bf16.msra.mxu1 %v1394_v20 }
 0x132   : > { %v1688_v14 = vpop.f32.mrb[13].mxu0  ;;  %1292 = vmatprep.subr.bf16.mxu1 %v1395_v21 }
 0x133   : > { %v1690_v15 = vpop.f32.mrb[14].mxu0 }
 0x134   : > { %v578_v16 = vpack.c.bf16 %v1690_v15, %v1686_v13  ;;  %v1694_v17 = vpop.f32.mrb[15].mxu0 }
 0x135   : > { %v579_v18 = vpack.c.bf16 %v1694_v17, %v1688_v14  ;;  %1293 = vmatpush3.bf16.msra.mxu1 %v1395_v21  ;;  %v1171_v21 = vld [vmem:[%s1753_s5] ss:$0 sm:$0xff] }
 0x136   : > { %1294 = vmatprep.subr.bf16.mxu1 %v1396_v22 }
 0x137   : > { %771 = vmatprep.mubr.bf16.mxu1 %v579_v18 }
 0x138   : > { %772 = vmatmul.mubr.bf16.gmra.mrb[12].mxu1 %v578_v16 }
 0x139   : > { %1295 = vmatpush3.bf16.msra.mxu1 %v1396_v22 }
 0x13a   : > { %1296 = vmatprep.subr.bf16.mxu1 %v1397_v23 }
 0x13d   : > { %1297 = vmatpush3.bf16.msra.mxu1 %v1397_v23 }
 0x1f3   : > { %v1246_v24 = vpop.f32.mrb[0].mxu1 }
 0x1f4   : > { %v1247_v26 = vpop.f32.mrb[1].mxu1 }
 0x1f5   : > { %v1248_v27 = vadd.f32 %v1247_v26, %v1246_v24  ;;  %v1249_v28 = vpop.f32.mrb[2].mxu1 }
 0x1f6   : > { %v1250_v29 = vpop.f32.mrb[3].mxu1 }
 0x1f7   : > { %v750_v30 = vadd.f32 %v1248_v27, %v1154_v25  ;;  %v1251_v31 = vadd.f32 %v1250_v29, %v1249_v28 }
 0x1f9   : > { %v753_v32 = vadd.f32 %v1251_v31, %v1154_v25  ;;  %v780_v33 = vmax.f32 %v750_v30, 0.0 }
 0x1fb   : > { %v781_v34 = vmax.f32 %v753_v32, 0.0  ;;  %v1252_v35 = vpop.f32.mrb[4].mxu1 }
 0x1fc   : > { %v1253_v36 = vpop.f32.mrb[5].mxu1 }
 0x1fd   : > { %v1254_v37 = vadd.f32 %v1253_v36, %v1252_v35  ;;  %v1255_v38 = vpop.f32.mrb[6].mxu1  ;;  %v788_v39 = vpack.c.bf16 %v781_v34, %v780_v33 }
 0x1fe   : > { %v1256_v40 = vpop.f32.mrb[7].mxu1 }
 0x1ff   : > { %v758_v41 = vadd.f32 %v1254_v37, %v1154_v25  ;;  %v1257_v42 = vadd.f32 %v1256_v40, %v1255_v38  ;;  %1298 = vmatprep.mubr.bf16.mxu1 %v788_v39 }
 0x201   : > { %v761_v43 = vadd.f32 %v1257_v42, %v1154_v25  ;;  %v782_v44 = vmax.f32 %v758_v41, 0.0 }
 0x203   : > { %v783_v45 = vmax.f32 %v761_v43, 0.0  ;;  %v1258_v46 = vpop.f32.mrb[8].mxu1 }
 0x204   : > { %v1259_v47 = vpop.f32.mrb[9].mxu1 }
 0x205   : > { %v789_v48 = vpack.c.bf16 %v783_v45, %v782_v44  ;;  %v1260_v49 = vadd.f32 %v1259_v47, %v1258_v46  ;;  %v1261_v50 = vpop.f32.mrb[10].mxu1 }
 0x206   : > { %v1262_v51 = vpop.f32.mrb[11].mxu1 }
 0x207   : > { %v766_v52 = vadd.f32 %v1260_v49, %v1154_v25  ;;  %v1263_v53 = vadd.f32 %v1262_v51, %v1261_v50  ;;  %1299 = vmatmul.mubr.bf16.vlgmr.msra.gmra.mrb[16].mxu1 %v789_v48 }
 0x209   : > { %v769_v54 = vadd.f32 %v1263_v53, %v1154_v25  ;;  %v784_v55 = vmax.f32 %v766_v52, 0.0 }
 0x20b   : > { %v785_v56 = vmax.f32 %v769_v54, 0.0  ;;  %v1264_v60 = vpop.f32.mrb[12].mxu1 }
 0x20c   : > { %v1265_v62 = vpop.f32.mrb[13].mxu1 }
 0x20d   : > { %v1266_v63 = vadd.f32 %v1265_v62, %v1264_v60  ;;  %v1267_v2 = vpop.f32.mrb[14].mxu1  ;;  %v790_v4 = vpack.c.bf16 %v785_v56, %v784_v55 }
 0x20e   : > { %v1268_v6 = vpop.f32.mrb[15].mxu1 }
 0x20f   : > { %v774_v10 = vadd.f32 %v1266_v63, %v1154_v25  ;;  %v1269_v12 = vadd.f32 %v1268_v6, %v1267_v2  ;;  %1302 = vmatprep.mubr.bf16.mxu1 %v790_v4 }
 0x211   : > { %v777_v16 = vadd.f32 %v1269_v12, %v1154_v25  ;;  %v786_v18 = vmax.f32 %v774_v10, 0.0 }
 0x213   : > { %v787_v19 = vmax.f32 %v777_v16, 0.0 }
 0x215   : > { %v791_v20 = vpack.c.bf16 %v787_v19, %v786_v18 }
 0x217   : > { %1303 = vmatmul.mubr.bf16.gmra.mrb[20].mxu1 %v791_v20 }
 0x2da   : > { %v1300_v22 = vpop.f32.mrb[16].mxu1 }
 0x2db   : > { %v906_v23 = vadd.f32 %v1300_v22, %v1171_v21  ;;  %v897_v24 = vpop.f32.mrb[17].mxu1 }
 0x2dc   : > { %v898_v26 = vadd.f32 %v1171_v21, %v897_v24  ;;  %v1301_v27 = vpop.f32.mrb[18].mxu1 }
 0x2dd   : > { %v1182_v28 = vmul.f32 -1.442695, %v906_v23  ;;  %v909_v29 = vadd.f32 %v1301_v27, %v1171_v21  ;;  %v900_v30 = vpop.f32.mrb[19].mxu1 }
 0x2de   : > { %v1180_v31 = vmul.f32 -1.442695, %v898_v26  ;;  %v901_v32 = vadd.f32 %v1171_v21, %v900_v30 }
 0x2df   : > { %1398 = vpow2.f32 %v1182_v28  ;;  %v1183_v25 = vmul.f32 -1.442695, %v909_v29 }
 0x2e0   : > { %1400 = vpow2.f32 %v1180_v31  ;;  %v1181_v33 = vmul.f32 -1.442695, %v901_v32 }
 0x2e1   : > { %1402 = vpow2.f32 %v1183_v25 }
 0x2e2   : > { %1404 = vpow2.f32 %v1181_v33 }
 0x2e9   : > { %v1399_v34 = vpop.eup %1398 }
 0x2ea   : > { %v1401_v35 = vpop.eup %1400  ;;  %v954_v36 = vadd.f32 1.0, %v1399_v34  ;;  %v1304_v37 = vpop.f32.mrb[20].mxu1 }
 0x2eb   : > { %v1403_v38 = vpop.eup %1402  ;;  %v952_v39 = vadd.f32 1.0, %v1401_v35  ;;  %v922_v40 = vadd.f32 %v1304_v37, %v1171_v21  ;;  %v913_v41 = vpop.f32.mrb[21].mxu1 }
 0x2ec   : > { %v1405_v42 = vpop.eup %1404  ;;  %1406 = vrcp.f32 %v954_v36  ;;  %v955_v43 = vadd.f32 1.0, %v1403_v38  ;;  %v914_v44 = vadd.f32 %v1171_v21, %v913_v41  ;;  %v1305_v45 = vpop.f32.mrb[22].mxu1 }
 0x2ed   : > { %1408 = vrcp.f32 %v952_v39  ;;  %v953_v46 = vadd.f32 1.0, %v1405_v42  ;;  %v1186_v47 = vmul.f32 -1.442695, %v922_v40  ;;  %v925_v48 = vadd.f32 %v1305_v45, %v1171_v21  ;;  %v916_v49 = vpop.f32.mrb[23].mxu1 }
 0x2ee   : > { %1410 = vrcp.f32 %v955_v43  ;;  %v1184_v50 = vmul.f32 -1.442695, %v914_v44  ;;  %v917_v51 = vadd.f32 %v1171_v21, %v916_v49 }
 0x2ef   : > { %1412 = vrcp.f32 %v953_v46  ;;  %v1187_v52 = vmul.f32 -1.442695, %v925_v48 }
 0x2f0   : > { %1414 = vpow2.f32 %v1186_v47  ;;  %v1185_v53 = vmul.f32 -1.442695, %v917_v51 }
 0x2f1   : > { %1416 = vpow2.f32 %v1184_v50 }
 0x2f2   : > { %1418 = vpow2.f32 %v1187_v52 }
 0x2f3   : > { %1420 = vpow2.f32 %v1185_v53 }
 0x2f6   : > { %v1407_v54 = vpop.eup %1406 }
 0x2f7   : > { %v1409_v55 = vpop.eup %1408  ;;  %v978_v56 = vmul.f32 %v1407_v54, %v1659_v0  ;;  %v986_v60 = vsub.f32 1.0, %v1407_v54 }
 0x2f8   : > { %v1411_v62 = vpop.eup %1410  ;;  %v976_v63 = vmul.f32 %v1409_v55, %v1644_v57  ;;  %v984_v2 = vsub.f32 1.0, %v1409_v55 }
 0x2f9   : > { %v1413_v4 = vpop.eup %1412  ;;  %v994_v6 = vmul.f32 %v986_v60, %v1661_v1  ;;  %v979_v10 = vmul.f32 %v1411_v62, %v1666_v3  ;;  %v987_v12 = vsub.f32 1.0, %v1411_v62 }
 0x2fa   : > { %v1415_v16 = vpop.eup %1414  ;;  %v992_v18 = vmul.f32 %v984_v2, %v1646_v58  ;;  %v977_v19 = vmul.f32 %v1413_v4, %v1648_v59  ;;  %v985_v20 = vsub.f32 1.0, %v1413_v4 }
 0x2fb   : > { %v1417_v21 = vpop.eup %1416  ;;  %v1002_v0 = vadd.f32 %v994_v6, %v978_v56  ;;  %v995_v22 = vmul.f32 %v987_v12, %v1670_v5  ;;  %v958_v23 = vadd.f32 1.0, %v1415_v16 }
 0x2fc   : > { %v1419_v57 = vpop.eup %1418  ;;  %v1000_v24 = vadd.f32 %v992_v18, %v976_v63  ;;  %v993_v26 = vmul.f32 %v985_v20, %v1652_v61  ;;  %v956_v1 = vadd.f32 1.0, %v1417_v21 }
 0x2fd   : > { %v1421_v27 = vpop.eup %1420  ;;  %v1003_v3 = vadd.f32 %v995_v22, %v979_v10  ;;  %1422 = vrcp.f32 %v958_v23  ;;  %v959_v28 = vadd.f32 1.0, %v1419_v57 }
 0x2fe   : > { %v1001_v58 = vadd.f32 %v993_v26, %v977_v19  ;;  %1424 = vrcp.f32 %v956_v1  ;;  %v957_v59 = vadd.f32 1.0, %v1421_v27 }
 0x2ff   : > { %v1215_v5 = vpack.c.bf16 %v1003_v3, %v1002_v0  ;;  %1426 = vrcp.f32 %v959_v28 }
 0x300   : > { %v1210_v29 = vpack.c.bf16 %v1001_v58, %v1000_v24  ;;  %1428 = vrcp.f32 %v957_v59 }
 0x301   : > { %1227 = vst [vmem:[%s1731_s16 + $0x8] sm:$0xff] %v1215_v5  }
 0x302   : > { %1211 = vst [vmem:[%s1731_s16] sm:$0xff] %v1210_v29  }
 0x307   : > { %v1423_v61 = vpop.eup %1422 }
 0x308   : > { %v1425_v30 = vpop.eup %1424  ;;  %v982_v31 = vmul.f32 %v1423_v61, %v1686_v13  ;;  %v990_v32 = vsub.f32 1.0, %v1423_v61 }
 0x309   : > { %v1427_v25 = vpop.eup %1426  ;;  %v980_v33 = vmul.f32 %v1425_v30, %v1674_v7  ;;  %v988_v34 = vsub.f32 1.0, %v1425_v30 }
 0x30a   : > { %v1429_v35 = vpop.eup %1428  ;;  %v998_v36 = vmul.f32 %v990_v32, %v1688_v14  ;;  %v983_v37 = vmul.f32 %v1427_v25, %v1690_v15  ;;  %v991_v38 = vsub.f32 1.0, %v1427_v25 }
 0x30b   : > { %v996_v39 = vmul.f32 %v988_v34, %v1676_v8  ;;  %v981_v40 = vmul.f32 %v1429_v35, %v1678_v9  ;;  %v989_v41 = vsub.f32 1.0, %v1429_v35 }
 0x30c   : > { %v1006_v42 = vadd.f32 %v998_v36, %v982_v31  ;;  %v999_v13 = vmul.f32 %v991_v38, %v1694_v17 }
 0x30d   : > { %v1004_v43 = vadd.f32 %v996_v39, %v980_v33  ;;  %v997_v7 = vmul.f32 %v989_v41, %v1682_v11 }
 0x30e   : > { %v1007_v44 = vadd.f32 %v999_v13, %v983_v37 }
 0x30f   : > { %v1005_v45 = vadd.f32 %v997_v7, %v981_v40 }
 0x310   : > { %v1225_v46 = vpack.c.bf16 %v1007_v44, %v1006_v42 }
 0x311   : > { %v1220_v47 = vpack.c.bf16 %v1005_v45, %v1004_v43 }
 0x312   : > { %1229 = vst [vmem:[%s1731_s16 + $0x18] sm:$0xff] %v1225_v46  }
 0x313   : > { %1228 = vst [vmem:[%s1731_s16 + $0x10] sm:$0xff] %v1220_v47  }
 0x314 PF: > { %s16_s21 = sadd.s32 1, %s1436_s21  }
 0x315   : > { %p13_p4 = scmp.ge.s32.totalorder %s16_s21, 6  }
 0x317   :  { %15 = sbr.rel (!%p13_p4) target bundleno = 1 (0x1), region = 74 }

// kernel: my_restormer_forward.5
= control target key start
LH: loop header
LB: loop body
LE: loop exit
PB: predicated region body
PF: predicated region fallthrough
CT: control target
= control target key end

     0   :  { %s2771_s24 = smov 0   ;;  %s3744_s0 = inlined_call_operand.vmem [shape: bf16[320,256], index: 0, kind: input, shape index: {}]   ;;  %s3745_s1 = inlined_call_operand.vmem [shape: bf16[256,128], index: 1, kind: input, shape index: {}]   ;;  %s3746_s2 = inlined_call_operand.vmem [shape: f32[256,8], index: 2, kind: input, shape index: {}]   ;;  %s3747_s3 = inlined_call_operand.vmem [shape: bf16[128,64], index: 3, kind: input, shape index: {}]   ;;  %s3748_s4 = inlined_call_operand.vmem [shape: f32[1,64], index: 4, kind: input, shape index: {}]   ;;  %s3749_s5 = inlined_call_operand.vmem [shape: bf16[576,8], index: 5, kind: input, shape index: {}]   ;;  %s3750_s6 = inlined_call_operand.vmem [shape: f32[1,8], index: 6, kind: input, shape index: {}]   ;;  %s3751_s7 = inlined_call_operand.vmem [shape: f32[256,8], index: 7, kind: output, shape index: {}]  }
   0x1 LB: > { %s2264_s25 = sadd.s32 4294967295, %s2726_s24   ;;  %p2268_p0 = scmp.ge.s32.totalorder %s2726_s24, 1  ;;  %s2726_s24 = sphi %s2771_s24, %s17_s24  }
   0x2   : > { %p238_p1 = scmp.lt.s32.totalorder %s2726_s24, 5 }
   0x4   : > { %p239_p2 = pnand %p2268_p0, %p238_p1 }
   0x5   : > { %v2604_v0 = vld [vmem:[%s3745_s1 + $0x40] sm:$0xff] (!%p239_p2)   ;;  %v2606_v2 = vld [vmem:[%s3745_s1 + $0x48] sm:$0xff] (!%p239_p2)   ;;  %v2608_v4 = vld [vmem:[%s3745_s1 + $0x50] sm:$0xff] (!%p239_p2)   ;;  %s2805_s19 = sshll.u32 (!%p239_p2), %s2264_s25, 6  ;;  %vm2728_vm1 = vmmov (!%p239_p2), 0   ;;  %s2269_s8 = sshll.u32 (!%p239_p2), %s2264_s25, 3 }
   0x6   : > { %242 = sbr.rel (%p239_p2) target bundleno = 925 (0x39d), region = 48  ;;  %v2605_v1 = vld [vmem:[%s3745_s1] sm:$0xff] (!%p239_p2)   ;;  %2377 = vmatprep.subr.bf16.mxu0 (!%p239_p2), %v2604_v0  ;;  %v2607_v3 = vld [vmem:[%s3745_s1 + $0x8] sm:$0xff] (!%p239_p2)   ;;  %v2609_v5 = vld [vmem:[%s3745_s1 + $0x10] sm:$0xff] (!%p239_p2)   ;;  %s2814_s26 = scalar_lea.vmem (!%p239_p2), %s3744_s0, %s2805_s19 }
   0x7   : > { %2378 = vmatpush3.bf16.msra.mxu0 (!%p239_p2), %v2605_v1  ;;  %v2610_v6 = vld [vmem:[%s3745_s1 + $0x58] sm:$0xff] (!%p239_p2)   ;;  %v2612_v8 = vld [vmem:[%s3745_s1 + $0x60] sm:$0xff] (!%p239_p2)   ;;  %v2614_v10 = vld [vmem:[%s3745_s1 + $0x68] sm:$0xff] (!%p239_p2)   ;;  %p271_p3 = scmp.lt.s32.totalorder (!%p239_p2), %s2269_s8, 31 }
   0x8   : > { %2379 = vmatprep.subr.bf16.mxu0 (!%p239_p2), %v2606_v2  ;;  %v2611_v7 = vld [vmem:[%s3745_s1 + $0x18] sm:$0xff] (!%p239_p2)   ;;  %v2613_v9 = vld [vmem:[%s3745_s1 + $0x20] sm:$0xff] (!%p239_p2)   ;;  %v2615_v12 = vld [vmem:[%s3745_s1 + $0x28] sm:$0xff] (!%p239_p2)  }
   0x9   : > { %v2622_v11 = vld [vmem:[%s2814_s26 + $0x4] ss:$8 sps:$4 sm:$0xff] (!%p239_p2)   ;;  %v2616_v13 = vld [vmem:[%s3745_s1 + $0x70] sm:$0xff] (!%p239_p2)   ;;  %v2618_v15 = vld [vmem:[%s3745_s1 + $0x78] sm:$0xff] (!%p239_p2)  }
   0xa   : > { %547 = vmatprep.mubr.bf16.mxu0 (!%p239_p2), %v2622_v11  ;;  %v2617_v14 = vld [vmem:[%s3745_s1 + $0x30] sm:$0xff] (!%p239_p2)   ;;  %v2619_v16 = vld [vmem:[%s3745_s1 + $0x38] sm:$0xff] (!%p239_p2)   ;;  %v2644_v17 = vld [vmem:[%s3747_s3] sm:$0xff] (!%p239_p2)  }
   0xb   : > { %2380 = vmatpush3.bf16.msra.mxu0 (!%p239_p2), %v2607_v3  ;;  %v2620_v18 = vld [vmem:[%s2814_s26] ss:$8 sps:$4 sm:$0xff] (!%p239_p2)   ;;  %v2623_v20 = vld [vmem:[%s2814_s26 + $0x14] ss:$8 sps:$4 sm:$0xff] (!%p239_p2)   ;;  %2545 = vmatprep.subr.bf16.mxu1 (!%p239_p2), %v2644_v17  ;;  %v2625_v23 = vld [vmem:[%s2814_s26 + $0x10] ss:$8 sps:$4 sm:$0xff] (!%p239_p2)  }
   0xc   : > { %2381 = vmatprep.subr.bf16.mxu0 (!%p239_p2), %v2608_v4  ;;  %v2645_v19 = vld [vmem:[%s3747_s3 + $0x8] sm:$0xff] (!%p239_p2)   ;;  %2546 = vmatpush3.bf16.msra.mxu1 (!%p239_p2), %v2644_v17  ;;  %v2646_v21 = vld [vmem:[%s3747_s3 + $0x10] sm:$0xff] (!%p239_p2)   ;;  %v2647_v22 = vld [vmem:[%s3747_s3 + $0x18] sm:$0xff] (!%p239_p2)  }
   0xd   : > { %2547 = vmatprep.subr.bf16.mxu1 %v2645_v19  ;;  %v2626_v24 = vld [vmem:[%s2814_s26 + $0x24] ss:$8 sps:$4 sm:$0xff]   ;;  %v2628_v25 = vld [vmem:[%s2814_s26 + $0x20] ss:$8 sps:$4 sm:$0xff]   ;;  %v2629_v26 = vld [vmem:[%s2814_s26 + $0x34] ss:$8 sps:$4 sm:$0xff]  }
   0xe   : > { %v2631_v27 = vld [vmem:[%s2814_s26 + $0x30] ss:$8 sps:$4 sm:$0xff]   ;;  %v2632_v28 = vld [vmem:[%s2814_s26 + $0x44] ss:$8 sps:$4 sm:$0xff]   ;;  %v2634_v29 = vld [vmem:[%s2814_s26 + $0x40] ss:$8 sps:$4 sm:$0xff]  }
   0xf   : > { %2382 = vmatpush3.bf16.msra.mxu0 %v2609_v5  ;;  %v2635_v30 = vld [vmem:[%s2814_s26 + $0x54] ss:$8 sps:$4 sm:$0xff]   ;;  %v2637_v31 = vld [vmem:[%s2814_s26 + $0x50] ss:$8 sps:$4 sm:$0xff]   ;;  %v2638_v32 = vld [vmem:[%s2814_s26 + $0x64] ss:$8 sps:$4 sm:$0xff]  }
  0x10   : > { %2383 = vmatprep.subr.bf16.mxu0 %v2610_v6  ;;  %2548 = vmatpush3.bf16.msra.mxu1 %v2645_v19  ;;  %v2640_v33 = vld [vmem:[%s2814_s26 + $0x60] ss:$8 sps:$4 sm:$0xff]   ;;  %v2641_v34 = vld [vmem:[%s2814_s26 + $0x74] ss:$8 sps:$4 sm:$0xff]   ;;  %v2643_v35 = vld [vmem:[%s2814_s26 + $0x70] ss:$8 sps:$4 sm:$0xff]  }
  0x11   : > { %2549 = vmatprep.subr.bf16.mxu1 %v2646_v21  ;;  %v2648_v36 = vld [vmem:[%s3747_s3 + $0x20] sm:$0xff]   ;;  %v2649_v37 = vld [vmem:[%s3747_s3 + $0x28] sm:$0xff]   ;;  %v2650_v38 = vld [vmem:[%s3747_s3 + $0x30] sm:$0xff]   ;;  %s2730_s26 = smov 64   ;;  %s3805_s8 = smov (!%p271_p3, %s2269_s8), 31 }
  0x12   : > { %v2651_v39 = vld [vmem:[%s3747_s3 + $0x38] sm:$0xff]   ;;  %vm1079_vm2 = vmpackc.low %vm2728_vm1, %vm2728_vm1  ;;  %s2270_s25 = sshll.u32 %s3805_s8, 3 }
  0x13   : > { %2384 = vmatpush3.bf16.msra.mxu0 %v2611_v7  ;;  %s3714_s11 = scalar_lea.vmem %s3746_s2, %s2270_s25 }
  0x14   : > { %2385 = vmatprep.subr.bf16.mxu0 %v2612_v8  ;;  %2550 = vmatpush3.bf16.msra.mxu1 %v2646_v21 }
  0x15   : > { %2551 = vmatprep.subr.bf16.mxu1 %v2647_v22 }
  0x17   : > { %2386 = vmatpush3.bf16.msra.mxu0 %v2613_v9 }
  0x18   : > { %2387 = vmatprep.subr.bf16.mxu0 %v2614_v10  ;;  %2552 = vmatpush3.bf16.msra.mxu1 %v2647_v22 }
  0x19   : > { %2553 = vmatprep.subr.bf16.mxu1 %v2648_v36 }
  0x1b   : > { %2388 = vmatpush3.bf16.msra.mxu0 %v2615_v12 }
  0x1c   : > { %2389 = vmatprep.subr.bf16.mxu0 %v2616_v13  ;;  %2554 = vmatpush3.bf16.msra.mxu1 %v2648_v36 }
  0x1d   : > { %2555 = vmatprep.subr.bf16.mxu1 %v2649_v37 }
  0x1f   : > { %2390 = vmatpush3.bf16.msra.mxu0 %v2617_v14 }
  0x20   : > { %2391 = vmatprep.subr.bf16.mxu0 %v2618_v15  ;;  %2556 = vmatpush3.bf16.msra.mxu1 %v2649_v37 }
  0x21   : > { %2557 = vmatprep.subr.bf16.mxu1 %v2650_v38 }
  0x23   : > { %2392 = vmatpush3.bf16.msra.mxu0 %v2619_v16 }
  0x24   : > { %2558 = vmatpush3.bf16.msra.mxu1 %v2650_v38 }
  0x25   : > { %2559 = vmatprep.subr.bf16.mxu1 %v2651_v39 }
  0x26   : > { %548 = vmatmul.mubr.bf16.vlgmr.msra.gmra.mrb[0].mxu0 %v2620_v18 }
  0x27   : > { %555 = vmatprep.mubr.bf16.mxu0 %v2623_v20 }
  0x28   : > { %2560 = vmatpush3.bf16.msra.mxu1 %v2651_v39 }
  0x2e   : > { %556 = vmatmul.mubr.bf16.gmra.mrb[4].mxu0 %v2625_v23 }
  0x2f   : > { %563 = vmatprep.mubr.bf16.mxu0 %v2626_v24 }
  0x36   : > { %564 = vmatmul.mubr.bf16.gmra.mrb[8].mxu0 %v2628_v25 }
  0x37   : > { %571 = vmatprep.mubr.bf16.mxu0 %v2629_v26 }
  0x3e   : > { %572 = vmatmul.mubr.bf16.gmra.mrb[12].mxu0 %v2631_v27 }
  0x3f   : > { %579 = vmatprep.mubr.bf16.mxu0 %v2632_v28 }
  0x46   : > { %580 = vmatmul.mubr.bf16.gmra.mrb[16].mxu0 %v2634_v29 }
  0x47   : > { %587 = vmatprep.mubr.bf16.mxu0 %v2635_v30 }
  0x4e   : > { %588 = vmatmul.mubr.bf16.gmra.mrb[20].mxu0 %v2637_v31 }
  0x4f   : > { %595 = vmatprep.mubr.bf16.mxu0 %v2638_v32 }
  0x56   : > { %596 = vmatmul.mubr.bf16.gmra.mrb[24].mxu0 %v2640_v33 }
  0x57   : > { %603 = vmatprep.mubr.bf16.mxu0 %v2641_v34 }
  0x5e   : > { %604 = vmatmul.mubr.bf16.gmra.mrb[28].mxu0 %v2643_v35 }
  0xf9   : > { %v2393_v40 = vpop.f32.mrb[0].mxu0 }
  0xfa   : > { %v2394_v41 = vpop.f32.mrb[1].mxu0 }
  0xfb   : > { %v2395_v42 = vadd.f32 %v2394_v41, %v2393_v40  ;;  %v2396_v43 = vpop.f32.mrb[2].mxu0 }
  0xfc   : > { %v2397_v44 = vpop.f32.mrb[3].mxu0 }
  0xfd   : > { %v2398_v45 = vadd.f32 %v2397_v44, %v2396_v43  ;;  %v612_v46 = vmul.f32 0.00390625, %v2395_v42 }
  0xff   : > { %v613_v47 = vmul.f32 0.00390625, %v2398_v45 }
 0x101   : > { %v2399_v48 = vpop.f32.mrb[4].mxu0  ;;  %v628_v49 = vpack.c.bf16 %v613_v47, %v612_v46 }
 0x102   : > { %v2400_v50 = vpop.f32.mrb[5].mxu0 }
 0x103   : > { %v2401_v51 = vadd.f32 %v2400_v50, %v2399_v48  ;;  %v2402_v52 = vpop.f32.mrb[6].mxu0  ;;  %2561 = vmatprep.mubr.bf16.mxu1 %v628_v49  ;;  %v820_v48 = vlaneseq  ;;  %v2880_v50 = vstv %s2805_s19  ;;  %s280_s19 = scalar_lea.vmem %s3751_s7, %s2270_s25 }
 0x104   : > { %v2403_v53 = vpop.f32.mrb[7].mxu0 }
 0x105   : > { %v2404_v54 = vadd.f32 %v2403_v53, %v2402_v52  ;;  %v614_v55 = vmul.f32 0.00390625, %v2401_v51  ;;  %v2877_v49 = vshrl.u32 %v820_v48, 7 }
 0x107   : > { %v615_v56 = vmul.f32 0.00390625, %v2404_v54  ;;  %v2884_v51 = vadd.s32 %v2880_v50, %v2877_v49  ;;  %v822_v52 = vadd.s32 8, %v2877_v49  ;;  %v835_v54 = vadd.s32 112, %v2877_v49 }
 0x109   : > { %v629_v57 = vpack.c.bf16 %v615_v56, %v614_v55  ;;  %v2405_v58 = vpop.f32.mrb[8].mxu0  ;;  %v2888_v53 = vadd.s32 %v2880_v50, %v822_v52  ;;  %v2892_v55 = vadd.s32 %v2880_v50, %v835_v54  ;;  %v836_v56 = vadd.s32 120, %v2877_v49 }
 0x10a   : > { %v2406_v59 = vpop.f32.mrb[9].mxu0  ;;  %vm854_vm1 = vcmp.ge.s32.totalorder %v2884_v51, 32 }
 0x10b   : > { %v2407_v60 = vadd.f32 %v2406_v59, %v2405_v58  ;;  %v2408_v61 = vpop.f32.mrb[10].mxu0  ;;  %2562 = vmatmul.mubr.bf16.vlgmr.msra.gmra.mrb[0].mxu1 %v629_v57  ;;  %v2896_v57 = vadd.s32 %v2880_v50, %v836_v56  ;;  %v2652_v58 = vld [vmem:[%s3749_s5 + $0xc0] sm:$0xff]  }
 0x10c   : > { %v2409_v62 = vpop.f32.mrb[11].mxu0  ;;  %v2653_v59 = vld [vmem:[%s3749_s5 + $0x80] sm:$0xff]   ;;  %2497 = vmatprep.subr.bf16.mxu0 %v2652_v58 }
 0x10d   : > { %v2410_v63 = vadd.f32 %v2409_v62, %v2408_v61  ;;  %v616_v0 = vmul.f32 0.00390625, %v2407_v60  ;;  %v2654_v60 = vld [vmem:[%s3749_s5 + $0xc8] sm:$0xff]   ;;  %v2656_v61 = vld [vmem:[%s3749_s5 + $0x40] sm:$0xff]   ;;  %2498 = vmatpush3.bf16.msra.mxu0 %v2653_v59 }
 0x10e   : > { %v2658_v62 = vld [vmem:[%s3749_s5] sm:$0xff]   ;;  %2457 = vmatprep.subr.bf16.mxu1 %v2656_v61  ;;  %2499 = vmatprep.subr.bf16.mxu0 %v2654_v60  ;;  %v2661_v59 = vld [vmem:[%s3749_s5 + $0x8] sm:$0xff]  }
 0x10f   : > { %v617_v1 = vmul.f32 0.00390625, %v2410_v63  ;;  %v2655_v63 = vld [vmem:[%s3749_s5 + $0x88] sm:$0xff]   ;;  %2458 = vmatpush3.bf16.msra.mxu1 %v2658_v62 }
 0x111   : > { %v630_v2 = vpack.c.bf16 %v617_v1, %v616_v0  ;;  %v2411_v3 = vpop.f32.mrb[12].mxu0  ;;  %v2657_v0 = vld [vmem:[%s3749_s5 + $0xd0] sm:$0xff]   ;;  %2500 = vmatpush3.bf16.msra.mxu0 %v2655_v63 }
 0x112   : > { %v2412_v4 = vpop.f32.mrb[13].mxu0  ;;  %v2659_v1 = vld [vmem:[%s3749_s5 + $0x90] sm:$0xff]   ;;  %2501 = vmatprep.subr.bf16.mxu0 %v2657_v0 }
 0x113   : > { %v2413_v5 = vadd.f32 %v2412_v4, %v2411_v3  ;;  %v2414_v6 = vpop.f32.mrb[14].mxu0  ;;  %2565 = vmatprep.mubr.bf16.mxu1 %v630_v2  ;;  %v823_v2 = vadd.s32 16, %v2877_v49  ;;  %v962_v3 = vand.u32 15, %v2877_v49  ;;  %v969_v4 = vand.u32 15, %v822_v52 }
 0x114   : > { %v2415_v7 = vpop.f32.mrb[15].mxu0 }
 0x115   : > { %v2416_v8 = vadd.f32 %v2415_v7, %v2414_v6  ;;  %v618_v9 = vmul.f32 0.00390625, %v2413_v5  ;;  %2502 = vmatpush3.bf16.msra.mxu0 %v2659_v1  ;;  %v976_v5 = vand.u32 15, %v823_v2  ;;  %vm1054_vm0 = vcmp.eq.s32.totalorder %v962_v3, 0 }
 0x116   : > { %vm1149_vm3 = vcmp.eq.s32.totalorder %v969_v4, 15  ;;  %vm1078_vm4 = vmpackc.low %vm1054_vm0, %vm1054_vm0  ;;  %v824_v7 = vadd.s32 24, %v2877_v49 }
 0x117   : > { %v619_v10 = vmul.f32 0.00390625, %v2416_v8  ;;  %vm2924_vm5 = vcmp.eq.s32.totalorder %v976_v5, 0  ;;  %v2930_v8 = vadd.s32 32, %v2877_v49  ;;  %vm1173_vm6 = vmpackc.low %vm1149_vm3, %vm1149_vm3 }
 0x118   : > { %vm1080_vm7 = vmpackc.low %vm2924_vm5, %vm2924_vm5  ;;  %vm1106_vm5 = vsmask.f32 7424 }
 0x119   : > { %v631_v11 = vpack.c.bf16 %v619_v10, %v618_v9  ;;  %v2417_v12 = vpop.f32.mrb[16].mxu0  ;;  %v2933_v9 = vadd.s32 40, %v2877_v49  ;;  %v983_v10 = vand.u32 15, %v824_v7 }
 0x11a   : > { %v2418_v13 = vpop.f32.mrb[17].mxu0 }
 0x11b   : > { %v2419_v14 = vadd.f32 %v2418_v13, %v2417_v12  ;;  %v2420_v15 = vpop.f32.mrb[18].mxu0  ;;  %2566 = vmatmul.mubr.bf16.gmra.mrb[4].mxu1 %v631_v11  ;;  %v2729_v11 = vmov 0   ;;  %vm1151_vm8 = vcmp.eq.s32.totalorder %v983_v10, 15  ;;  %v843_v61 = vadd.s32 %v2880_v50, %v2933_v9 }
 0x11c   : > { %v2421_v16 = vpop.f32.mrb[19].mxu0  ;;  %v2936_v12 = vsel %vm1079_vm2, 65537, %v2729_v11  ;;  %v1086_v13 = vsel %vm1078_vm4, 65537, %v2729_v11  ;;  %vm1175_vm10 = vmpackc.low %vm1151_vm8, %vm1151_vm8  ;;  %vm870_vm2 = vcmp.lt.s32.totalorder %v2884_v51, 288  ;;  %vm871_vm8 = vcmp.lt.s32.totalorder %v2888_v53, 288 }
 0x11d   : > { %v2422_v17 = vadd.f32 %v2421_v16, %v2420_v15  ;;  %v620_v18 = vmul.f32 0.00390625, %v2419_v14  ;;  %v990_v14 = vand.u32 15, %v2930_v8  ;;  %v1181_v15 = vsel %vm1173_vm6, 65537, %v2729_v11 }
 0x11e   : > { %v2317_v16 = vcombine.low %v1086_v13, %v2936_v12 }
 0x11f   : > { %v621_v19 = vmul.f32 0.00390625, %v2422_v17  ;;  %v997_v17 = vand.u32 15, %v2933_v9  ;;  %vm2950_vm9 = vcmp.eq.s32.totalorder %v990_v14, 0 }
 0x120   : > { %vm1082_vm12 = vmpackc.low %vm2950_vm9, %vm2950_vm9 }
 0x121   : > { %v632_v20 = vpack.c.bf16 %v621_v19, %v620_v18  ;;  %v2423_v21 = vpop.f32.mrb[20].mxu0  ;;  %v1088_v18 = vsel %vm1080_vm7, 65537, %v2729_v11  ;;  %v2948_v19 = vadd.s32 48, %v2877_v49  ;;  %vm2955_vm11 = vcmp.eq.s32.totalorder %v997_v17, 15 }
 0x122   : > { %v2424_v22 = vpop.f32.mrb[21].mxu0  ;;  %vm1177_vm13 = vmpackc.low %vm2955_vm11, %vm2955_vm11  ;;  %vm855_vm7 = vcmp.ge.s32.totalorder %v2888_v53, 32  ;;  %v2663_v53 = vld [vmem:[%s3749_s5 + $0xd8] sm:$0xff]  }
 0x123   : > { %v2425_v23 = vadd.f32 %v2424_v22, %v2423_v21  ;;  %v2426_v24 = vpop.f32.mrb[22].mxu0  ;;  %2569 = vmatprep.mubr.bf16.mxu1 %v632_v20  ;;  %v2321_v21 = vcombine.low %v2936_v12, %v1181_v15  ;;  %v1108_v22 = vshll.u32 %v2317_v16, 16  ;;  %vm3034_vm11 = vmand %vm854_vm1, %vm870_vm2  ;;  %2503 = vmatprep.subr.bf16.mxu0 %v2663_v53  ;;  %vm3752_vm2 = vsmask.f32 256 }
 0x124   : > { %v2427_v25 = vpop.f32.mrb[23].mxu0 }
 0x125   : > { %v2428_v26 = vadd.f32 %v2427_v25, %v2426_v24  ;;  %v622_v27 = vmul.f32 0.00390625, %v2425_v23  ;;  %v2960_v24 = vcombine.low %v1088_v18, %v2936_v12  ;;  %v840_v25 = vadd.s32 %v2880_v50, %v823_v2 }
 0x127   : > { %v623_v28 = vmul.f32 0.00390625, %v2428_v26  ;;  %v1004_v26 = vand.u32 15, %v2948_v19  ;;  %vm856_vm14 = vcmp.ge.s32.totalorder %v840_v25, 32  ;;  %vm872_vm0 = vcmp.lt.s32.totalorder %v840_v25, 288  ;;  %v2666_v25 = vld [vmem:[%s3749_s5 + $0x58] sm:$0xff]  }
 0x128   : > { %vm3017_vm9 = vmand %vm856_vm14, %vm872_vm0  ;;  %v1119_v6 = vshrl.u32 %v2960_v24, 16 }
 0x129   : > { %v633_v29 = vpack.c.bf16 %v623_v28, %v622_v27  ;;  %v2429_v30 = vpop.f32.mrb[24].mxu0  ;;  %v1183_v27 = vsel %vm1175_vm10, 65537, %v2729_v11  ;;  %v1202_v28 = vshrl.u32 %v2321_v21, 16  ;;  %vm2979_vm15 = vcmp.eq.s32.totalorder %v1004_v26, 0 }
 0x12a   : > { %v2430_v31 = vpop.f32.mrb[25].mxu0  ;;  %vm1084_vm4 = vmpackc.low %vm2979_vm15, %vm2979_vm15 }
 0x12b   : > { %v2431_v32 = vadd.f32 %v2430_v31, %v2429_v30  ;;  %v2432_v33 = vpop.f32.mrb[26].mxu0  ;;  %2570 = vmatmul.mubr.bf16.gmra.mrb[8].mxu1 %v633_v29  ;;  %v2971_v29 = vrot.slane %v1108_v22, 1  ;;  %v1111_v30 = vshrl.u32 %v2317_v16, 16  ;;  %v1115_v31 = vshll.u32 %v2960_v24, 16  ;;  %v2662_v16 = vld [vmem:[%s3749_s5 + $0x50] sm:$0xff]   ;;  %v2665_v22 = vld [vmem:[%s3749_s5 + $0x98] sm:$0xff]  }
 0x12c   : > { %v2433_v34 = vpop.f32.mrb[27].mxu0  ;;  %v1092_v1 = vsel %vm1084_vm4, 65537, %v2729_v11  ;;  %2504 = vmatpush3.bf16.msra.mxu0 %v2665_v22 }
 0x12d   : > { %v2434_v35 = vadd.f32 %v2433_v34, %v2432_v33  ;;  %v624_v36 = vmul.f32 0.00390625, %v2431_v32  ;;  %v841_v32 = vadd.s32 %v2880_v50, %v824_v7  ;;  %v1090_v33 = vsel %vm1082_vm12, 65537, %v2729_v11 }
 0x12e   : > { %v2977_v34 = vcombine.low %v2936_v12, %v1183_v27  ;;  %vm1138_vm10 = vcmp.ne.s16.totalorder %v2971_v29, 0  ;;  %v3099_v27 = vadd.s32 %v2880_v50, %v2948_v19 }
 0x12f   : > { %v625_v37 = vmul.f32 0.00390625, %v2434_v35  ;;  %vm857_vm3 = vcmp.ge.s32.totalorder %v841_v32, 32  ;;  %vm873_vm6 = vcmp.lt.s32.totalorder %v841_v32, 288  ;;  %v2669_v32 = vld [vmem:[%s3749_s5 + $0xe0] sm:$0xff]  }
 0x130   : > { %vm3052_vm12 = vmand %vm857_vm3, %vm873_vm6  ;;  %v1212_v15 = vshll.u32 %v2977_v34, 16  ;;  %v2668_v35 = vld [vmem:[%s3749_s5 + $0x60] sm:$0xff]   ;;  %2505 = vmatprep.subr.bf16.mxu0 %v2669_v32  ;;  %vm860_vm3 = vcmp.ge.s32.totalorder %v3099_v27, 32  ;;  %vm876_vm4 = vcmp.lt.s32.totalorder %v3099_v27, 288  ;;  %v830_v27 = vadd.s32 72, %v2877_v49 }
 0x131   : > { %v634_v38 = vpack.c.bf16 %v625_v37, %v624_v36  ;;  %v2435_v39 = vpop.f32.mrb[28].mxu0  ;;  %v1185_v36 = vsel %vm1177_vm13, 65537, %v2729_v11  ;;  %v2985_v37 = vrot.slane %v1202_v28, 7  ;;  %vm3063_vm13 = vmand %vm855_vm7, %vm871_vm8  ;;  %v3103_v28 = vadd.s32 %v2880_v50, %v2930_v8 }
 0x132   : > { %v2436_v40 = vpop.f32.mrb[29].mxu0 }
 0x133   : > { %v2437_v41 = vadd.f32 %v2436_v40, %v2435_v39  ;;  %v2438_v42 = vpop.f32.mrb[30].mxu0  ;;  %2573 = vmatprep.mubr.bf16.mxu1 %v634_v38  ;;  %v1205_v38 = vshll.u32 %v2321_v21, 16  ;;  %v2990_v39 = vld [vmem:[%s3748_s4] ss:$0 sm:$0xff]  ;;  %v1113_v40 = vor.u32 %v1111_v30, %v2971_v29  ;;  %v2664_v21 = vld [vmem:[%s3749_s5 + $0x10] sm:$0xff]   ;;  %v3106_v30 = vcombine.low %v1092_v1, %v2936_v12 }
 0x134   : > { %v2439_v43 = vpop.f32.mrb[31].mxu0  ;;  %vm858_vm6 = vcmp.ge.s32.totalorder %v3103_v28, 32  ;;  %v831_v1 = vadd.s32 80, %v2877_v49  ;;  %vm874_vm7 = vcmp.lt.s32.totalorder %v3103_v28, 288  ;;  %v2674_v28 = vld [vmem:[%s3749_s5 + $0x70] sm:$0xff]  }
 0x135   : > { %v2440_v44 = vadd.f32 %v2439_v43, %v2438_v42  ;;  %v626_v45 = vmul.f32 0.00390625, %v2437_v41  ;;  %v2994_v41 = vrot.slane %v1115_v31, 1  ;;  %v2997_v42 = vcombine.low %v1090_v33, %v2936_v12  ;;  %v2667_v31 = vld [vmem:[%s3749_s5 + $0x18] sm:$0xff]  }
 0x136   : > { %v3003_v43 = vadd.s32 56, %v2877_v49  ;;  %v3024_v58 = vor.u32 %v1205_v38, %v2985_v37  ;;  %v3223_v22 = vadd.s32 %v2880_v50, %v831_v1 }
 0x137   : > { %v627_v46 = vmul.f32 0.00390625, %v2440_v44  ;;  %v3006_v44 = vcombine.low %v2936_v12, %v1185_v36  ;;  %v3040_v63 = vsel %vm1106_vm5, %v1113_v40, %v2994_v41  ;;  %v1123_v0 = vshll.u32 %v2997_v42, 16  ;;  %v2671_v36 = vld [vmem:[%s3749_s5 + $0xa0] sm:$0xff]  }
 0x138   : > { %v1011_v56 = vand.u32 15, %v3003_v43  ;;  %vm1139_vm15 = vcmp.ne.s16.totalorder %v3040_v63, 0  ;;  %vm1232_vm0 = vcmp.ne.s16.totalorder %v3024_v58, 0  ;;  %v1121_v8 = vor.u32 %v1119_v6, %v2994_v41  ;;  %2506 = vmatpush3.bf16.msra.mxu0 %v2671_v36 }
 0x139   : > { %v635_v47 = vpack.c.bf16 %v627_v46, %v626_v45  ;;  %v1209_v46 = vshrl.u32 %v2977_v34, 16  ;;  %v1217_v5 = vshrl.u32 %v3006_v44, 16  ;;  %v1125_v34 = vrot.slane %v1123_v0, 1 }
 0x13a   : > { %vm3075_vm14 = vcmp.eq.s32.totalorder %v1011_v56, 15  ;;  %v2670_v56 = vld [vmem:[%s3749_s5 + $0x20] sm:$0xff]  }
 0x13b   : > { %2574 = vmatmul.mubr.bf16.gmra.mrb[12].mxu1 %v635_v47  ;;  %v2660_v47 = vld [vmem:[%s3749_s5 + $0x48] sm:$0xff]   ;;  %v3067_v14 = vrot.slane %v1209_v46, 7  ;;  %vm1179_vm1 = vmpackc.low %vm3075_vm14, %vm3075_vm14  ;;  %v3130_v46 = vrot.slane %v1217_v5, 7 }
 0x13c   : > { %2459 = vmatprep.subr.bf16.mxu1 %v2660_v47 }
 0x13d   : > { %2460 = vmatpush3.bf16.msra.mxu1 %v2661_v59  ;;  %v1214_v40 = vor.u32 %v1212_v15, %v3067_v14 }
 0x13e   : > { %2461 = vmatprep.subr.bf16.mxu1 %v2662_v16 }
 0x141   : > { %2462 = vmatpush3.bf16.msra.mxu1 %v2664_v21 }
 0x142   : > { %2463 = vmatprep.subr.bf16.mxu1 %v2666_v25 }
 0x145   : > { %2464 = vmatpush3.bf16.msra.mxu1 %v2667_v31 }
 0x146   : > { %2465 = vmatprep.subr.bf16.mxu1 %v2668_v35 }
 0x149   : > { %2466 = vmatpush3.bf16.msra.mxu1 %v2670_v56 }
 0x1de   : > { %v2563_v45 = vpop.f32.mrb[0].mxu1 }
 0x1df   : > { %v750_v48 = vadd.f32 %v2563_v45, %v2990_v39  ;;  %v741_v54 = vpop.f32.mrb[1].mxu1  ;;  %v1127_v45 = vshrl.u32 %v2997_v42, 16  ;;  %v1187_v42 = vsel %vm1179_vm1, 65537, %v2729_v11  ;;  %v845_v11 = vadd.s32 %v2880_v50, %v3003_v43 }
 0x1e0   : > { %v742_v60 = vadd.f32 %v2990_v39, %v741_v54  ;;  %v2564_v62 = vpop.f32.mrb[2].mxu1  ;;  %v1131_v54 = vshll.u32 %v3106_v30, 16  ;;  %v3175_v0 = vcombine.low %v2936_v12, %v1187_v42  ;;  %v829_v12 = vadd.s32 64, %v2877_v49  ;;  %v2677_v42 = vld [vmem:[%s3749_s5 + $0xa8] sm:$0xff]  }
 0x1e1   : > { %v806_v51 = vmax.f32 %v750_v48, 0.0  ;;  %v753_v2 = vadd.f32 %v2564_v62, %v2990_v39  ;;  %v744_v4 = vpop.f32.mrb[3].mxu1  ;;  %v1220_v48 = vshll.u32 %v3006_v44, 16  ;;  %v3172_v62 = vsel %vm1106_vm5, %v1121_v8, %v1125_v34  ;;  %v2676_v8 = vld [vmem:[%s3749_s5 + $0x30] sm:$0xff]  }
 0x1e2   : > { %v804_v7 = vmax.f32 %v742_v60, 0.0  ;;  %v745_v10 = vadd.f32 %v2990_v39, %v744_v4  ;;  %v1129_v9 = vor.u32 %v1127_v45, %v1125_v34  ;;  %vm861_vm8 = vcmp.ge.s32.totalorder %v845_v11, 32  ;;  %v2672_v4 = vld [vmem:[%s3749_s5 + $0x68] sm:$0xff]  }
 0x1e3   : > { %v936_v17 = vsel %vm3017_vm9, %v806_v51, 0.0  ;;  %v807_v18 = vmax.f32 %v753_v2, 0.0  ;;  %v1222_v43 = vor.u32 %v1220_v48, %v3130_v46  ;;  %v3183_v51 = vsel %vm3752_vm2, %v2985_v37, %v1214_v40  ;;  %2467 = vmatprep.subr.bf16.mxu1 %v2672_v4  ;;  %v2675_v48 = vld [vmem:[%s3749_s5 + $0xe8] sm:$0xff]  }
 0x1e4   : > { %v934_v23 = vsel %vm3034_vm11, %v804_v7, 0.0  ;;  %v805_v24 = vmax.f32 %v745_v10, 0.0  ;;  %v3185_v2 = vrot.slane %v1131_v54, 1  ;;  %vm877_vm9 = vcmp.lt.s32.totalorder %v845_v11, 288  ;;  %v2673_v7 = vld [vmem:[%s3749_s5 + $0x28] sm:$0xff]   ;;  %v2678_v54 = vld [vmem:[%s3749_s5 + $0x78] sm:$0xff]   ;;  %2507 = vmatprep.subr.bf16.mxu0 %v2675_v48 }
 0x1e5   : > { %v937_v26 = vsel %vm3052_vm12, %v807_v18, 0.0  ;;  %vm859_vm11 = vcmp.ge.s32.totalorder %v843_v61, 32  ;;  %vm875_vm12 = vcmp.lt.s32.totalorder %v843_v61, 288  ;;  %v832_v37 = vadd.s32 88, %v2877_v49  ;;  %2468 = vmatpush3.bf16.msra.mxu1 %v2673_v7  ;;  %2508 = vmatpush3.bf16.msra.mxu0 %v2677_v42 }
 0x1e6   : > { %v3114_v33 = vpack.c.bf16 %v937_v26, %v936_v17  ;;  %v935_v19 = vsel %vm3063_vm13, %v805_v24, 0.0  ;;  %vm3201_vm13 = vmand %vm860_vm3, %vm876_vm4  ;;  %vm1140_vm14 = vcmp.ne.s16.totalorder %v3172_v62, 0  ;;  %vm1233_vm1 = vcmp.ne.s16.totalorder %v3183_v51, 0  ;;  %2469 = vmatprep.subr.bf16.mxu1 %v2674_v28 }
 0x1e7   : > { %v950_v38 = vpack.c.bf16 %v935_v19, %v934_v23  ;;  %v1225_v16 = vshrl.u32 %v3175_v0, 16  ;;  %v3211_v17 = vsel %vm3752_vm2, %v3067_v14, %v1222_v43  ;;  %vm3217_vm3 = vmand %vm858_vm6, %vm874_vm7  ;;  %vm1308_vm4 = vcmask 1046528  }
 0x1e8   : > { %v1242_v41 = vsel %vm1138_vm10, 0, %v3114_v33  ;;  %v1263_v47 = vshll.u32 %v3114_v33, 16  ;;  %v3140_v52 = vsel %vm1232_vm0, 0, %v3114_v33  ;;  %v3160_v59 = vsel %vm1139_vm15, 0, %v3114_v33  ;;  %vm3231_vm2 = vmand %vm861_vm8, %vm877_vm9 }
 0x1e9   : > { %1323 = vrot.lane.b32.xlu1 %v1242_v41, %s2730_s26  ;;  %v3152_v44 = vsel %vm1138_vm10, 0, %v950_v38  ;;  %v3227_v14 = vsel %vm1106_vm5, %v1129_v9, %v3185_v2  ;;  %v3237_v26 = vadd.s32 %v2880_v50, %v829_v12  ;;  %vm891_vm6 = vmand %vm859_vm11, %vm875_vm12  ;;  %v3248_v19 = vadd.s32 %v2880_v50, %v832_v37  ;;  %2470 = vmatpush3.bf16.msra.mxu1 %v2676_v8  ;;  %v3358_v8 = vld [vmem:[%s3749_s5 + $0x100] sm:$0xff]  }
 0x1ea   : > { %v3162_v60 = vrot.slane %v1263_v47, 1  ;;  %vm1234_vm7 = vcmp.ne.s16.totalorder %v3211_v17, 0  ;;  %v3256_v36 = vrot.slane %v1225_v16, 7  ;;  %v1228_v38 = vshll.u32 %v3175_v0, 16  ;;  %v2679_v0 = vld [vmem:[%s3749_s5 + $0x38] sm:$0xff]   ;;  %2471 = vmatprep.subr.bf16.mxu1 %v2678_v54 }
 0x1eb   : > { %vm864_vm8 = vcmp.ge.s32.totalorder %v3223_v22, 32  ;;  %vm880_vm9 = vcmp.lt.s32.totalorder %v3223_v22, 288  ;;  %vm1141_vm11 = vcmp.ne.s16.totalorder %v3227_v14, 0  ;;  %vm862_vm12 = vcmp.ge.s32.totalorder %v3237_v26, 32 }
 0x1ec   : > { %v3269_v47 = vadd.s32 %v2880_v50, %v830_v27  ;;  %v1266_v56 = vshrl.u32 %v3114_v33, 16  ;;  %v1135_v61 = vshrl.u32 %v3106_v30, 16  ;;  %v1230_v9 = vor.u32 %v1228_v38, %v3256_v36 }
 0x1ed   : > { %1293 = vrot.lane.b32.xlu1 %v3162_v60, %s2730_s26  ;;  %v1309_v33 = vrot.slane %v3140_v52, 1  ;;  %2472 = vmatpush3.bf16.msra.mxu1 %v2679_v0 }
 0x1ee   : > { %v2567_v3 = vpop.f32.mrb[4].mxu1  ;;  %v3377_v48 = vor.u32 %v1135_v61, %v3185_v2  ;;  %v834_v2 = vadd.s32 104, %v2877_v49  ;;  %2577 = vmatprep.subr.bf16.mxu1 %v3358_v8 }
 0x1ef   : > { %v766_v5 = vadd.f32 %v2567_v3, %v2990_v39  ;;  %v757_v6 = vpop.f32.mrb[5].mxu1  ;;  %v1268_v3 = vor.u32 %v1266_v56, %v3162_v60 }
 0x1f0   : > { %v758_v13 = vadd.f32 %v2990_v39, %v757_v6  ;;  %v2568_v15 = vpop.f32.mrb[6].mxu1 }
 0x1f1   : > { %v810_v18 = vmax.f32 %v766_v5, 0.0  ;;  %v769_v53 = vadd.f32 %v2568_v15, %v2990_v39  ;;  %v760_v21 = vpop.f32.mrb[7].mxu1 }
 0x1f2   : > { %v808_v23 = vmax.f32 %v758_v13, 0.0  ;;  %v761_v25 = vadd.f32 %v2990_v39, %v760_v21  ;;  %v2680_v21 = vld [vmem:[%s3749_s5 + $0xf0] sm:$0xff]  }
 0x1f3   : > { %v940_v31 = vsel %vm3201_vm13, %v810_v18, 0.0  ;;  %v811_v32 = vmax.f32 %v769_v53, 0.0  ;;  %vm878_vm13 = vcmp.lt.s32.totalorder %v3237_v26, 288  ;;  %2509 = vmatprep.subr.bf16.mxu0 %v2680_v21 }
 0x1f4   : > { %v938_v34 = vsel %vm3217_vm3, %v808_v23, 0.0  ;;  %v809_v35 = vmax.f32 %v761_v25, 0.0  ;;  %v2681_v23 = vld [vmem:[%s3749_s5 + $0xb0] sm:$0xff]   ;;  %vm879_vm3 = vcmp.lt.s32.totalorder %v3269_v47, 288 }
 0x1f5   : > { %v941_v40 = vsel %vm3231_vm2, %v811_v32, 0.0  ;;  %vm865_vm2 = vcmp.ge.s32.totalorder %v3248_v19, 32  ;;  %2510 = vmatpush3.bf16.msra.mxu0 %v2681_v23 }
 0x1f6   : > { %v3264_v45 = vpack.c.bf16 %v941_v40, %v940_v31  ;;  %v939_v41 = vsel %vm891_vm6, %v809_v35, 0.0  ;;  %v833_v31 = vadd.s32 96, %v2877_v49  ;;  %vm894_vm6 = vmand %vm862_vm12, %vm878_vm13  ;;  %vm1236_vm13 = vcmp.ne.s16.totalorder %v3256_v36, 0 }
 0x1f7   : > { %v952_v11 = vpack.c.bf16 %v939_v41, %v938_v34 }
 0x1f8   : > { %v1278_v43 = vshll.u32 %v3264_v45, 16  ;;  %v3290_v1 = vsel %vm1233_vm1, 0, %v3264_v45  ;;  %v3315_v15 = vsel %vm1234_vm7, 0, %v3264_v45  ;;  %v3346_v29 = vsel %vm1141_vm11, 0, %v3264_v45 }
 0x1f9   : > { %v1243_v30 = vsel %vm1139_vm15, 0, %v952_v11  ;;  %v1270_v12 = vshll.u32 %v952_v11, 16  ;;  %v3299_v4 = vsel %vm1232_vm0, 0, %v952_v11  ;;  %v1274_v5 = vshrl.u32 %v952_v11, 16 }
 0x1fa   : > { %1325 = vrot.lane.b32.xlu0 %v1243_v30, %s2730_s26  ;;  %v1346_v6 = vrot.slane %v3299_v4, 1  ;;  %v1347_v37 = vrot.slane %v3290_v1, 1  ;;  %v1238_v60 = vsel %vm1233_vm1, 0, %v952_v11  ;;  %v3310_v13 = vsel %vm1140_vm14, 0, %v952_v11 }
 0x1fb   : > { %v3306_v7 = vrot.slane %v1270_v12, 1  ;;  %v1310_v10 = vrot.slane %v1238_v60, 1  ;;  %v3317_v16 = vrot.slane %v1278_v43, 1  ;;  %v1312_v20 = vrot.slane %v3315_v15, 1 }
 0x1fc   : > { %v1348_v18 = vsel %vm1308_vm4, %v1346_v6, %v1347_v37  ;;  %v3327_v53 = vsel %vm1138_vm10, 0, %v952_v11  ;;  %v3363_v34 = vsel %vm1139_vm15, 0, %v3264_v45  ;;  %v3368_v35 = vsel %vm1232_vm0, 0, %v3264_v45  ;;  %vm3383_vm15 = vmand %vm864_vm8, %vm880_vm9 }
 0x1fd   : > { %v1273_v24 = vsel %vm1106_vm5, %v1268_v3, %v3306_v7  ;;  %v1276_v25 = vor.u32 %v1274_v5, %v3306_v7  ;;  %v3341_v27 = vsel %vm1308_vm4, %v1309_v33, %v1310_v10  ;;  %v3353_v32 = vsel %vm1308_vm4, %v1310_v10, %v1312_v20  ;;  %v2684_v10 = vld [vmem:[%s3749_s5 + $0xb8] sm:$0xff]  }
 0x1fe   : > { %v2571_v28 = vpop.f32.mrb[8].mxu1  ;;  %1295 = vrot.lane.b32.xlu0 %v1273_v24, %s2730_s26  ;;  %vm881_vm10 = vcmp.lt.s32.totalorder %v3248_v19, 288  ;;  %vm863_vm0 = vcmp.ge.s32.totalorder %v3269_v47, 32  ;;  %v1244_v11 = vsel %vm1140_vm14, 0, %v3264_v45  ;;  %vm3779_vm8 = vsmask.f32 256 }
 0x1ff   : > { %v782_v38 = vadd.f32 %v2571_v28, %v2990_v39  ;;  %v773_v40 = vpop.f32.mrb[9].mxu1  ;;  %v3374_v41 = vsel %vm1106_vm5, %v1276_v25, %v3317_v16  ;;  %v3404_v61 = vsel %vm3779_vm8, %v3130_v46, %v1230_v9  ;;  %vm897_vm9 = vmand %vm865_vm2, %vm881_vm10  ;;  %v3413_v0 = vadd.s32 %v2880_v50, %v833_v31 }
 0x200   : > { %v774_v63 = vadd.f32 %v2990_v39, %v773_v40  ;;  %v2572_v42 = vpop.f32.mrb[10].mxu1  ;;  %1297 = vrot.lane.b32.xlu1 %v3374_v41, %s2730_s26  ;;  %vm895_vm12 = vmand %vm863_vm0, %vm879_vm3  ;;  %vm1142_vm2 = vcmp.ne.s16.totalorder %v3377_v48, 0  ;;  %v3425_v9 = vadd.s32 %v2880_v50, %v834_v2  ;;  %vm1235_vm10 = vcmp.ne.s16.totalorder %v3404_v61, 0  ;;  %v2683_v50 = vld [vmem:[%s3749_s5 + $0xf8] sm:$0xff]  }
 0x201   : > { %v814_v54 = vmax.f32 %v782_v38, 0.0  ;;  %v785_v22 = vadd.f32 %v2572_v42, %v2990_v39  ;;  %v776_v56 = vpop.f32.mrb[11].mxu1  ;;  %vm884_vm8 = vcmp.lt.s32.totalorder %v2892_v55, 288  ;;  %v1386_v47 = vrot.slane %v3368_v35, 1  ;;  %2511 = vmatprep.subr.bf16.mxu0 %v2683_v50 }
 0x202   : > { %v812_v49 = vmax.f32 %v774_v63, 0.0  ;;  %v777_v26 = vadd.f32 %v2990_v39, %v776_v56  ;;  %1327 = vrot.lane.b32.xlu0 %v1244_v11, %s2730_s26  ;;  %v1282_v60 = vshrl.u32 %v3264_v45, 16  ;;  %vm882_vm3 = vcmp.lt.s32.totalorder %v3413_v0, 288  ;;  %2512 = vmatpush3.bf16.msra.mxu0 %v2684_v10 }
 0x203   : > { %v944_v43 = vsel %vm3383_vm15, %v814_v54, 0.0  ;;  %v815_v3 = vmax.f32 %v785_v22, 0.0  ;;  %vm868_vm15 = vcmp.ge.s32.totalorder %v2892_v55, 32  ;;  %vm883_vm0 = vcmp.lt.s32.totalorder %v3425_v9, 288 }
 0x204   : > { %v942_v46 = vsel %vm894_vm6, %v812_v49, 0.0  ;;  %v813_v19 = vmax.f32 %v777_v26, 0.0  ;;  %1357 = vrot.lane.b32.xlu1 %v1348_v18, %s2730_s26  ;;  %vm869_vm6 = vcmp.ge.s32.totalorder %v2896_v57, 32  ;;  %v1284_v45 = vor.u32 %v1282_v60, %v3317_v16 }
 0x205   : > { %v945_v30 = vsel %vm897_vm9, %v815_v3, 0.0  ;;  %vm885_vm9 = vcmp.lt.s32.totalorder %v2896_v57, 288 }
 0x206   : > { %v3431_v12 = vpack.c.bf16 %v945_v30, %v944_v43  ;;  %v943_v5 = vsel %vm895_vm12, %v813_v19, 0.0  ;;  %1373 = vrot.lane.b32.xlu0 %v3317_v16, %s2730_s26  ;;  %vm867_vm12 = vcmp.ge.s32.totalorder %v3425_v9, 32 }
 0x207   : > { %v954_v18 = vpack.c.bf16 %v943_v5, %v942_v46 }
 0x208   : > { %1355 = vrot.lane.b32.xlu1 %v1346_v6, %s2730_s26  ;;  %v1334_v21 = vshll.u32 %v3431_v12, 16  ;;  %v3456_v23 = vsel %vm1234_vm7, 0, %v3431_v12  ;;  %v1246_v4 = vsel %vm1142_vm2, 0, %v3431_v12  ;;  %v3463_v6 = vshrl.u32 %v1386_v47, 16 }
 0x209   : > { %v1258_v24 = vsel %vm1233_vm1, 0, %v954_v18  ;;  %v1286_v25 = vshll.u32 %v954_v18, 16  ;;  %v1290_v28 = vshrl.u32 %v954_v18, 16  ;;  %v1249_v31 = vsel %vm1234_vm7, 0, %v954_v18 }
 0x20a   : > { %v1387_v16 = vrot.slane %v1258_v24, 1  ;;  %v1389_v35 = vrot.slane %v3456_v23, 1  ;;  %v1349_v40 = vrot.slane %v1249_v31, 1  ;;  %v3471_v51 = vsel %vm1235_vm10, 0, %v3431_v12 }
 0x20b   : > { %v1288_v38 = vrot.slane %v1286_v25, 1  ;;  %v3475_v58 = vsel %vm1140_vm14, 0, %v954_v18  ;;  %v3477_v63 = vrot.slane %v1334_v21, 1  ;;  %v1351_v42 = vrot.slane %v3471_v51, 1  ;;  %vm3524_vm14 = vmand %vm868_vm15, %vm884_vm8 }
 0x20c   : > { %v1390_v17 = vsel %vm1308_vm4, %v1387_v16, %v1389_v35  ;;  %v1240_v2 = vsel %vm1235_vm10, 0, %v954_v18  ;;  %v1350_v62 = vsel %vm1308_vm4, %v1347_v37, %v1349_v40  ;;  %v1241_v26 = vsel %vm1236_vm13, 0, %v3431_v12  ;;  %vm899_vm15 = vmand %vm867_vm12, %vm883_vm0 }
 0x20d   : > { %v3486_v54 = vsel %vm1106_vm5, %v1284_v45, %v1288_v38  ;;  %v1292_v22 = vor.u32 %v1290_v28, %v1288_v38  ;;  %v1314_v56 = vrot.slane %v1240_v2, 1  ;;  %v3496_v49 = vsel %vm1308_vm4, %v1349_v40, %v1351_v42 }
 0x20e   : > { %v2575_v11 = vpop.f32.mrb[12].mxu1  ;;  %1299 = vrot.lane.b32.xlu0 %v3486_v54, %s2730_s26  ;;  %v3503_v43 = vsel %vm1142_vm2, 0, %v954_v18  ;;  %v3508_v1 = vsel %vm1141_vm11, 0, %v3431_v12  ;;  %v1316_v30 = vrot.slane %v1241_v26, 1  ;;  %v1245_v15 = vsel %vm1141_vm11, 0, %v954_v18  ;;  %vm901_vm11 = vmand %vm869_vm6, %vm885_vm9 }
 0x20f   : > { %v798_v37 = vadd.f32 %v2575_v11, %v2990_v39  ;;  %v789_v3 = vpop.f32.mrb[13].mxu1  ;;  %v3513_v46 = vsel %vm1106_vm5, %v1292_v22, %v3477_v63  ;;  %v3518_v19 = vsel %vm1308_vm4, %v1312_v20, %v1314_v56  ;;  %v1388_v20 = vsel %vm1308_vm4, %v1386_v47, %v1387_v16 }
 0x210   : > { %v790_v60 = vadd.f32 %v2990_v39, %v789_v3  ;;  %v2576_v50 = vpop.f32.mrb[14].mxu1  ;;  %1375 = vrot.lane.b32.xlu1 %v3513_v46, %s2730_s26  ;;  %v1615_v10 = vshrl.u32 %v1390_v17, 16  ;;  %vm3782_vm1 = vcmp.ge.s32.totalorder %v3413_v0, 32  ;;  %v3544_v25 = vsel %vm1308_vm4, %v1314_v56, %v1316_v30 }
 0x211   : > { %v818_v45 = vmax.f32 %v798_v37, 0.0  ;;  %vm3538_vm7 = vmand %vm3782_vm1, %vm882_vm3  ;;  %v801_v21 = vadd.f32 %v2576_v50, %v2990_v39  ;;  %v792_v24 = vpop.f32.mrb[15].mxu1  ;;  %v1579_v14 = vshrl.u32 %v1388_v20, 16  ;;  %v1618_v16 = vshll.u32 %v1390_v17, 16 }
 0x212   : > { %v816_v18 = vmax.f32 %v790_v60, 0.0  ;;  %v793_v47 = vadd.f32 %v2990_v39, %v792_v24  ;;  %1329 = vrot.lane.b32.xlu0 %v1245_v15, %s2730_s26  ;;  %v1617_v0 = vrot.slane %v1615_v10, 7  ;;  %v1582_v40 = vshll.u32 %v1388_v20, 16 }
 0x213   : > { %v948_v28 = vsel %vm3524_vm14, %v818_v45, 0.0  ;;  %v819_v31 = vmax.f32 %v801_v21, 0.0  ;;  %v1581_v38 = vrot.slane %v1579_v14, 7  ;;  %v1577_v17 = vrot.slane %v3463_v6, 7 }
 0x214   : > { %v946_v57 = vsel %vm3538_vm7, %v816_v18, 0.0  ;;  %v817_v2 = vmax.f32 %v793_v47, 0.0  ;;  %1331 = vrot.lane.b32.xlu1 %v1246_v4, %s2730_s26  ;;  %v1620_v39 = vor.u32 %v1618_v16, %v1617_v0  ;;  %vm3785_vm8 = vsmask.f32 256 }
 0x215   : > { %v949_v56 = vsel %vm901_vm11, %v819_v31, 0.0  ;;  %v1584_v11 = vor.u32 %v1582_v40, %v1581_v38  ;;  %vm3786_vm0 = vmmov %vm3785_vm8  ;;  %v1338_v60 = vshrl.u32 %v3431_v12, 16 }
 0x216   : > { %v957_v26 = vpack.c.bf16 %v949_v56, %v948_v28  ;;  %v947_v37 = vsel %vm899_vm15, %v817_v2, 0.0  ;;  %1359 = vrot.lane.b32.xlu0 %v1350_v62, %s2730_s26  ;;  %v3564_v9 = vsel %vm3785_vm8, %v1581_v38, %v1620_v39  ;;  %vm3791_vm3 = vmmov %vm3786_vm0 }
 0x217   : > { %v956_v3 = vpack.c.bf16 %v947_v37, %v946_v57  ;;  %v3567_v30 = vsel %vm3786_vm0, %v1577_v17, %v1584_v11  ;;  %v3582_v10 = vor.u32 %v1338_v60, %v3477_v63  ;;  %vm3792_vm6 = vmmov %vm3786_vm0 }
 0x218   : > { %v1261_v5 = vsel %vm1236_vm13, 0, %v957_v26  ;;  %vm3793_vm9 = vmmov %vm3786_vm0 }
 0x219   : > { %v1393_v4 = vrot.slane %v1261_v5, 1  ;;  %v1366_v50 = vshll.u32 %v956_v3, 16  ;;  %v1260_v6 = vsel %vm1235_vm10, 0, %v956_v3  ;;  %v1251_v15 = vsel %vm1236_vm13, 0, %v956_v3  ;;  %vm3790_vm10 = vmmov %vm3786_vm0 }
 0x21a   : > { %1301 = vrot.lane.b32.xlu0 %v1292_v22, %s2730_s26  ;;  %v1391_v62 = vrot.slane %v1260_v6, 1  ;;  %v3579_v20 = vsel %vm1142_vm2, 0, %v956_v3  ;;  %v1353_v55 = vrot.slane %v1251_v15, 1  ;;  %v1370_v63 = vshrl.u32 %v956_v3, 16  ;;  %vm3789_vm2 = vmmov %vm3786_vm0 }
 0x21b   : > { %v1368_v45 = vrot.slane %v1366_v50, 1  ;;  %vm1395_vm13 = vcmask 523264   ;;  %vm3794_vm12 = vmmov %vm3786_vm0 }
 0x21c   : > { %v1392_v61 = vsel %vm1308_vm4, %v1389_v35, %v1391_v62  ;;  %v1394_v12 = vsel %vm1308_vm4, %v1391_v62, %v1393_v4  ;;  %v1354_v36 = vsel %vm1308_vm4, %v1351_v42, %v1353_v55  ;;  %vm3788_vm4 = vmmov %vm3786_vm0 }
 0x21d   : > { %v1369_v22 = vsel %vm1106_vm5, %v3582_v10, %v1368_v45  ;;  %v1651_v48 = vshrl.u32 %v1392_v61, 16  ;;  %v1687_v21 = vshrl.u32 %v1394_v12, 16  ;;  %v1654_v24 = vshll.u32 %v1392_v61, 16  ;;  %vm3787_vm5 = vmmov %vm3786_vm0 }
 0x21e   : > { %1377 = vrot.lane.b32.xlu1 %v1369_v22, %s2730_s26  ;;  %1361 = vrot.lane.b32.xlu0 %v3496_v49, %s2730_s26  ;;  %v1372_v35 = vor.u32 %v1370_v63, %v1368_v45  ;;  %v1690_v18 = vshll.u32 %v1394_v12, 16  ;;  %vm3795_vm14 = vmmov %vm3786_vm0 }
 0x21f   : > { %v1653_v23 = vrot.slane %v1651_v48, 7  ;;  %v1689_v14 = vrot.slane %v1687_v21, 7  ;;  %vm3796_vm1 = vmmov %vm3786_vm0 }
 0x220   : > { %vm3797_vm7 = vmmov %vm3786_vm0 }
 0x221   : > { %v1656_v47 = vor.u32 %v1654_v24, %v1653_v23  ;;  %v1692_v51 = vor.u32 %v1690_v18, %v1689_v14  ;;  %v2686_v14 = vld [vmem:[%s3749_s5 + $0x110] sm:$0xff]   ;;  %vm3798_vm11 = vmmov %vm3786_vm0 }
 0x222   : > { %1379 = vrot.lane.b32.xlu1 %v1372_v35, %s2730_s26  ;;  %1363 = vrot.lane.b32.xlu0 %v1354_v36, %s2730_s26  ;;  %v2685_v36 = vld [vmem:[%s3749_s5 + $0x108] sm:$0xff]   ;;  %vm3799_vm15 = vmmov %vm3786_vm0 }
 0x223   : > { %v3599_v42 = vsel %vm3787_vm5, %v1617_v0, %v1656_v47  ;;  %v3602_v16 = vsel %vm3788_vm4, %v1653_v23, %v1692_v51  ;;  %vm3800_vm8 = vmmov %vm3786_vm0 }
 0x224   : > { %vm3801_vm5 = vmmov %vm3786_vm0 }
 0x225   : > { %vm3802_vm4 = vmmov %vm3786_vm0 }
 0x25b   : > { %v1324_v49 = vpop.permute.xlu1 %1323 }
 0x25c   : > { %v1413_v28 = vsel %vm1395_vm13, %v1309_v33, %v1324_v49 }
 0x25d   : > { %v1544_v57 = vshrl.u32 %v1413_v28, 16 }
 0x25f   : > { %v1294_v38 = vpop.permute.xlu1 %1293  ;;  %v1546_v26 = vrot.slane %v1544_v57, 7 }
 0x260   : > { %v1398_v0 = vsel %vm1395_vm13, %v3152_v44, %v1294_v38 }
 0x261   : > { %v1534_v3 = vshrl.u32 %v1398_v0, 16 }
 0x263   : > { %v1536_v61 = vrot.slane %v1534_v3, 7 }
 0x26c   : > { %v1326_v31 = vpop.permute.xlu0 %1325 }
 0x26d   : > { %v1416_v40 = vsel %vm1395_vm13, %v3341_v27, %v1326_v31 }
 0x26e   : > { %v1547_v2 = vshrl.u32 %v1416_v40, 16  ;;  %v1550_v56 = vshll.u32 %v1416_v40, 16 }
 0x270   : > { %v1549_v39 = vrot.slane %v1547_v2, 7  ;;  %v1296_v17 = vpop.permute.xlu0 %1295 }
 0x271   : > { %v1401_v11 = vsel %vm1395_vm13, %v3160_v59, %v1296_v17 }
 0x272   : > { %v1552_v52 = vor.u32 %v1550_v56, %v1549_v39  ;;  %v1537_v37 = vshrl.u32 %v1401_v11, 16  ;;  %v1298_v33 = vpop.permute.xlu1 %1297  ;;  %v1540_v4 = vshll.u32 %v1401_v11, 16 }
 0x273   : > { %v1404_v5 = vsel %vm1395_vm13, %v3310_v13, %v1298_v33 }
 0x274   : > { %v1539_v27 = vrot.slane %v1537_v37, 7  ;;  %v1586_v60 = vshrl.u32 %v1404_v5, 16  ;;  %v1328_v50 = vpop.permute.xlu0 %1327  ;;  %v1553_v44 = vsel %vm3789_vm2, %v1546_v26, %v1552_v52  ;;  %v1589_v15 = vshll.u32 %v1404_v5, 16  ;;  %vm3803_vm2 = vmmov %vm3786_vm0 }
 0x275   : > { %v1419_v6 = vsel %vm1395_vm13, %v3353_v32, %v1328_v50  ;;  %1970 = vmatprep.mubr.bf16.mxu1 %v1553_v44 }
 0x276   : > { %v1542_v62 = vor.u32 %v1540_v4, %v1539_v27  ;;  %v3618_v59 = vrot.slane %v1586_v60, 7  ;;  %v1593_v45 = vshrl.u32 %v1419_v6, 16  ;;  %v1358_v55 = vpop.permute.xlu1 %1357  ;;  %v1596_v22 = vshll.u32 %v1419_v6, 16 }
 0x277   : > { %v1431_v23 = vsel %vm1395_vm13, %v3374_v41, %v1358_v55  ;;  %v2687_v41 = vld [vmem:[%s3749_s5 + $0x118] sm:$0xff]  }
 0x278   : > { %v1591_v12 = vor.u32 %v1589_v15, %v3618_v59  ;;  %v3621_v13 = vrot.slane %v1593_v45, 7  ;;  %v1543_v48 = vsel %vm3790_vm10, %v1536_v61, %v1542_v62  ;;  %v1374_v24 = vpop.permute.xlu0 %1373  ;;  %v1557_v47 = vshrl.u32 %v1431_v23, 16 }
 0x279   : > { %1971 = vmatmul.mubr.bf16.vlgmr.msra.gmra.mrb[16].mxu1 %v1543_v48  ;;  %v1560_v26 = vshll.u32 %v1431_v23, 16 }
 0x27a   : > { %v1598_v32 = vor.u32 %v1596_v22, %v3621_v13  ;;  %v1592_v63 = vsel %vm3791_vm3, %v1539_v27, %v1591_v12  ;;  %v1356_v21 = vpop.permute.xlu1 %1355  ;;  %2578 = vmatpush3.bf16.msra.mxu1 %v3358_v8  ;;  %v1443_v8 = vsel %vm1395_vm13, %v3327_v53, %v1374_v24  ;;  %v1559_v57 = vrot.slane %v1557_v47, 7 }
 0x27b   : > { %2579 = vmatprep.subr.bf16.mxu1 %v2685_v36  ;;  %v1428_v18 = vsel %vm1395_vm13, %v3306_v7, %v1356_v21  ;;  %v1564_v2 = vshrl.u32 %v1443_v8, 16 }
 0x27c   : > { %v1599_v35 = vsel %vm3792_vm6, %v1549_v39, %v1598_v32  ;;  %v1554_v49 = vshrl.u32 %v1428_v18, 16  ;;  %v1562_v4 = vor.u32 %v1560_v26, %v1559_v57 }
 0x27d   : > { %1978 = vmatprep.mubr.bf16.mxu1 %v1599_v35  ;;  %v1566_v60 = vrot.slane %v1564_v2, 7 }
 0x27e   : > { %2580 = vmatpush3.bf16.msra.mxu1 %v2685_v36 }
 0x27f   : > { %2581 = vmatprep.subr.bf16.mxu1 %v2686_v14 }
 0x280   : > { %v1300_v51 = vpop.permute.xlu0 %1299 }
 0x281   : > { %v1407_v28 = vsel %vm1395_vm13, %v3346_v29, %v1300_v51  ;;  %v1445_v31 = vsel %vm1395_vm13, %v3363_v34, %v1300_v51  ;;  %1979 = vmatmul.mubr.bf16.gmra.mrb[20].mxu1 %v1592_v63  ;;  %v1556_v34 = vrot.slane %v1554_v49, 7 }
 0x282   : > { %v1567_v38 = vshrl.u32 %v1445_v31, 16  ;;  %v1622_v7 = vshrl.u32 %v1407_v28, 16  ;;  %v1376_v40 = vpop.permute.xlu1 %1375  ;;  %v1570_v53 = vshll.u32 %v1445_v31, 16  ;;  %2582 = vmatpush3.bf16.msra.mxu1 %v2686_v14  ;;  %v1625_v17 = vshll.u32 %v1407_v28, 16 }
 0x283   : > { %v1448_v0 = vsel %vm1395_vm13, %v3475_v58, %v1376_v40  ;;  %2583 = vmatprep.subr.bf16.mxu1 %v2687_v41  ;;  %v1563_v61 = vsel %vm3794_vm12, %v1556_v34, %v1562_v4 }
 0x284   : > { %v1569_v39 = vrot.slane %v1567_v38, 7  ;;  %v3649_v56 = vrot.slane %v1622_v7, 7  ;;  %v1607_v11 = vshrl.u32 %v1448_v0, 16  ;;  %v1330_v29 = vpop.permute.xlu0 %1329  ;;  %v1610_v52 = vshll.u32 %v1448_v0, 16 }
 0x285   : > { %v1422_v37 = vsel %vm1395_vm13, %v3518_v19, %v1330_v29 }
 0x286   : > { %v1572_v33 = vor.u32 %v1570_v53, %v1569_v39  ;;  %v1627_v3 = vor.u32 %v1625_v17, %v3649_v56  ;;  %v3654_v5 = vrot.slane %v1607_v11, 7  ;;  %v1629_v58 = vshrl.u32 %v1422_v37, 16  ;;  %v1332_v27 = vpop.permute.xlu1 %1331  ;;  %2584 = vmatpush3.bf16.msra.mxu1 %v2687_v41 }
 0x287   : > { %v1425_v50 = vsel %vm1395_vm13, %v3544_v25, %v1332_v27  ;;  %v1632_v62 = vshll.u32 %v1422_v37, 16 }
 0x288   : > { %v1612_v44 = vor.u32 %v1610_v52, %v3654_v5  ;;  %v1631_v6 = vrot.slane %v1629_v58, 7  ;;  %v1665_v15 = vshrl.u32 %v1425_v50, 16  ;;  %v1360_v45 = vpop.permute.xlu0 %1359  ;;  %v1573_v55 = vsel %vm3793_vm9, %v1566_v60, %v1572_v33 }
 0x289   : > { %v1434_v19 = vsel %vm1395_vm13, %v3486_v54, %v1360_v45  ;;  %v1628_v12 = vsel %vm3795_vm14, %v3618_v59, %v1627_v3  ;;  %v1668_v25 = vshll.u32 %v1425_v50, 16  ;;  %2035 = vmatprep.mubr.bf16.mxu0 %v1573_v55 }
 0x28a   : > { %v1634_v22 = vor.u32 %v1632_v62, %v1631_v6  ;;  %v1667_v36 = vrot.slane %v1665_v15, 7  ;;  %v1600_v48 = vshrl.u32 %v1434_v19, 16  ;;  %2036 = vmatmul.mubr.bf16.vlgmr.msra.gmra.mrb[32].mxu0 %v1563_v61  ;;  %v1613_v32 = vsel %vm3796_vm1, %v1569_v39, %v1612_v44 }
 0x28b   : > { %v1603_v23 = vshll.u32 %v1434_v19, 16  ;;  %2043 = vmatprep.mubr.bf16.mxu0 %v1613_v32 }
 0x28c   : > { %v1670_v63 = vor.u32 %v1668_v25, %v1667_v36  ;;  %v1602_v21 = vrot.slane %v1600_v48, 7  ;;  %v1302_v54 = vpop.permute.xlu0 %1301  ;;  %v1635_v24 = vsel %vm3797_vm7, %v3621_v13, %v1634_v22 }
 0x28d   : > { %v1410_v35 = vsel %vm1395_vm13, %v3503_v43, %v1302_v54  ;;  %1986 = vmatprep.mubr.bf16.mxu1 %v1635_v24 }
 0x28e   : > { %v1605_v59 = vor.u32 %v1603_v23, %v1602_v21  ;;  %v1658_v14 = vshrl.u32 %v1410_v35, 16  ;;  %1987 = vmatmul.mubr.bf16.gmra.mrb[24].mxu1 %v1628_v12  ;;  %v1671_v18 = vsel %vm3798_vm11, %v1631_v6, %v1670_v63  ;;  %v1661_v8 = vshll.u32 %v1410_v35, 16 }
 0x28f   : > { %1994 = vmatprep.mubr.bf16.mxu1 %v1671_v18 }
 0x290   : > { %v1660_v47 = vrot.slane %v1658_v14, 7  ;;  %v1378_v51 = vpop.permute.xlu1 %1377  ;;  %v1362_v41 = vpop.permute.xlu0 %1361  ;;  %v1606_v49 = vsel %vm3799_vm15, %v1559_v57, %v1605_v59 }
 0x291   : > { %v1451_v28 = vsel %vm1395_vm13, %v3508_v1, %v1378_v51  ;;  %v1437_v13 = vsel %vm1395_vm13, %v3513_v46, %v1362_v41 }
 0x292   : > { %v1663_v43 = vor.u32 %v1661_v8, %v1660_v47  ;;  %v1643_v31 = vshrl.u32 %v1451_v28, 16  ;;  %v1636_v38 = vshrl.u32 %v1437_v13, 16  ;;  %v1646_v7 = vshll.u32 %v1451_v28, 16  ;;  %2044 = vmatmul.mubr.bf16.gmra.mrb[36].mxu0 %v1606_v49 }
 0x293   : > { %v1639_v53 = vshll.u32 %v1437_v13, 16 }
 0x294   : > { %v1645_v40 = vrot.slane %v1643_v31, 7  ;;  %v1638_v2 = vrot.slane %v1636_v38, 7  ;;  %v1380_v0 = vpop.permute.xlu1 %1379  ;;  %v1364_v39 = vpop.permute.xlu0 %1363  ;;  %v1664_v17 = vsel %vm3800_vm8, %v3649_v56, %v1663_v43 }
 0x295   : > { %v1454_v57 = vsel %vm1395_vm13, %v3579_v20, %v1380_v0  ;;  %v1440_v1 = vsel %vm1395_vm13, %v3582_v10, %v1364_v39 }
 0x296   : > { %v1648_v46 = vor.u32 %v1646_v7, %v1645_v40  ;;  %v1641_v11 = vor.u32 %v1639_v53, %v1638_v2  ;;  %v1679_v29 = vshrl.u32 %v1454_v57, 16  ;;  %1995 = vmatmul.mubr.bf16.gmra.mrb[28].mxu1 %v1664_v17  ;;  %v1672_v26 = vshrl.u32 %v1440_v1, 16 }
 0x297   : > { %2585 = vmatprep.mubr.msk.bf16.mxu1 %vm1395_vm13, %v3567_v30  ;;  %v1682_v52 = vshll.u32 %v1454_v57, 16  ;;  %v1675_v10 = vshll.u32 %v1440_v1, 16 }
 0x298   : > { %v1681_v34 = vrot.slane %v1679_v29, 7  ;;  %v1649_v37 = vsel %vm3786_vm0, %v3654_v5, %v1648_v46  ;;  %v1642_v56 = vsel %vm3801_vm5, %v1602_v21, %v1641_v11  ;;  %v1674_v33 = vrot.slane %v1672_v26, 7  ;;  %v2135_v29 = vld [vmem:[%s3714_s11 + $0x10] sm:$0xff] }
 0x299   : > { %2051 = vmatprep.mubr.bf16.mxu0 %v1649_v37 }
 0x29a   : > { %v1684_v20 = vor.u32 %v1682_v52, %v1681_v34  ;;  %2052 = vmatmul.mubr.bf16.gmra.mrb[40].mxu0 %v1642_v56  ;;  %v1677_v58 = vor.u32 %v1675_v10, %v1674_v33  ;;  %v2133_v56 = vld [vmem:[%s3714_s11] sm:$0xff] }
 0x29c   : > { %v1685_v3 = vsel %vm3802_vm4, %v1645_v40, %v1684_v20  ;;  %v1678_v30 = vsel %vm3803_vm2, %v1638_v2, %v1677_v58 }
 0x29d   : > { %2059 = vmatprep.mubr.bf16.mxu0 %v1685_v3  ;;  %v2136_v3 = vld [vmem:[%s3714_s11 + $0x18] sm:$0xff] }
 0x29e   : > { %2586 = vmatmul.mubr.msk.bf16.vlgmr.msra.gmra.mrb[32].mxu1 %vm1395_vm13, %v3564_v9 }
 0x29f   : > { %2589 = vmatprep.mubr.msk.bf16.mxu1 %vm1395_vm13, %v3599_v42  ;;  %v3698_v42 = vld [vmem:[%s3750_s6] ss:$0 sm:$0xff] }
 0x2a2   : > { %2060 = vmatmul.mubr.bf16.gmra.mrb[44].mxu0 %v1678_v30 }
 0x2a6   : > { %2590 = vmatmul.mubr.msk.bf16.gmra.mrb[36].mxu1 %vm1395_vm13, %v3602_v16  ;;  %vm2197_vm13 = vcmask 64512  }
 0x34c   : > { %v2473_v5 = vpop.f32.mrb[16].mxu1 }
 0x34d   : > { %v2474_v27 = vpop.f32.mrb[17].mxu1 }
 0x34e   : > { %v2475_v4 = vadd.f32 %v2474_v27, %v2473_v5  ;;  %v2476_v60 = vpop.f32.mrb[18].mxu1  ;;  %v2134_v27 = vld [vmem:[%s3714_s11 + $0x8] sm:$0xff] }
 0x34f   : > { %v2477_v50 = vpop.f32.mrb[19].mxu1 }
 0x350   : > { %v2478_v44 = vadd.f32 %v2477_v50, %v2476_v60  ;;  %v1973_v61 = vadd.f32 %v2475_v4, %v3698_v42 }
 0x352   : > { %v1976_v48 = vadd.f32 %v2478_v44, %v3698_v42 }
 0x354   : > { %v2479_v6 = vpop.f32.mrb[20].mxu1 }
 0x355   : > { %v2480_v62 = vpop.f32.mrb[21].mxu1 }
 0x356   : > { %v2481_v15 = vadd.f32 %v2480_v62, %v2479_v6  ;;  %v2482_v9 = vpop.f32.mrb[22].mxu1 }
 0x357   : > { %v2483_v45 = vpop.f32.mrb[23].mxu1 }
 0x358   : > { %v2484_v19 = vadd.f32 %v2483_v45, %v2482_v9  ;;  %v1981_v47 = vadd.f32 %v2481_v15, %v3698_v42 }
 0x35a   : > { %v1984_v28 = vadd.f32 %v2484_v19, %v3698_v42 }
 0x35d   : > { %v2513_v55 = vpop.f32.mrb[32].mxu0 }
 0x35e   : > { %v2514_v16 = vpop.f32.mrb[33].mxu0 }
 0x35f   : > { %v2515_v12 = vadd.f32 %v2514_v16, %v2513_v55  ;;  %v2516_v22 = vpop.f32.mrb[34].mxu0 }
 0x360   : > { %v2517_v36 = vpop.f32.mrb[35].mxu0 }
 0x361   : > { %v2485_v25 = vpop.f32.mrb[24].mxu1  ;;  %v2518_v32 = vadd.f32 %v2517_v36, %v2516_v22  ;;  %v2038_v21 = vadd.f32 %v2515_v12, %v1973_v61 }
 0x362   : > { %v2486_v63 = vpop.f32.mrb[25].mxu1 }
 0x363   : > { %v2487_v23 = vadd.f32 %v2486_v63, %v2485_v25  ;;  %v2488_v54 = vpop.f32.mrb[26].mxu1  ;;  %v2041_v35 = vadd.f32 %v2518_v32, %v1976_v48 }
 0x364   : > { %v2489_v24 = vpop.f32.mrb[27].mxu1 }
 0x365   : > { %v2490_v59 = vadd.f32 %v2489_v24, %v2488_v54  ;;  %v2519_v14 = vpop.f32.mrb[36].mxu0  ;;  %v1989_v17 = vadd.f32 %v2487_v23, %v3698_v42  ;;  %v2139_v23 = vld [vmem:[%s3714_s11 + $0x30] sm:$0xff] }
 0x366   : > { %v2520_v18 = vpop.f32.mrb[37].mxu0 }
 0x367   : > { %v2521_v8 = vadd.f32 %v2520_v18, %v2519_v14  ;;  %v2522_v51 = vpop.f32.mrb[38].mxu0  ;;  %v1992_v26 = vadd.f32 %v2490_v59, %v3698_v42  ;;  %v2138_v18 = vld [vmem:[%s3714_s11 + $0x28] sm:$0xff] }
 0x368   : > { %v2523_v41 = vpop.f32.mrb[39].mxu0 }
 0x369   : > { %v2491_v49 = vpop.f32.mrb[28].mxu1  ;;  %v2524_v13 = vadd.f32 %v2523_v41, %v2522_v51  ;;  %v2046_v31 = vadd.f32 %v2521_v8, %v1981_v47  ;;  %v2140_v8 = vld [vmem:[%s3714_s11 + $0x38] sm:$0xff] }
 0x36a   : > { %v2492_v43 = vpop.f32.mrb[29].mxu1 }
 0x36b   : > { %v2493_v38 = vadd.f32 %v2492_v43, %v2491_v49  ;;  %v2494_v7 = vpop.f32.mrb[30].mxu1  ;;  %v2049_v2 = vadd.f32 %v2524_v13, %v1984_v28 }
 0x36c   : > { %v2495_v40 = vpop.f32.mrb[31].mxu1 }
 0x36d   : > { %v2496_v53 = vadd.f32 %v2495_v40, %v2494_v7  ;;  %v2525_v0 = vpop.f32.mrb[40].mxu0  ;;  %v1997_v19 = vadd.f32 %v2493_v38, %v3698_v42 }
 0x36e   : > { %v2526_v39 = vpop.f32.mrb[41].mxu0 }
 0x36f   : > { %v2527_v57 = vadd.f32 %v2526_v39, %v2525_v0  ;;  %v2528_v1 = vpop.f32.mrb[42].mxu0  ;;  %v2000_v25 = vadd.f32 %v2496_v53, %v3698_v42 }
 0x370   : > { %v2529_v46 = vpop.f32.mrb[43].mxu0 }
 0x371   : > { %v2587_v11 = vpop.f32.mrb[32].mxu1  ;;  %v2530_v34 = vadd.f32 %v2529_v46, %v2528_v1  ;;  %v2054_v20 = vadd.f32 %v2527_v57, %v1989_v17 }
 0x372   : > { %v2111_v52 = vadd.f32 %v2587_v11, %v2046_v31  ;;  %v2102_v37 = vpop.f32.mrb[33].mxu1 }
 0x373   : > { %v2103_v33 = vadd.f32 %v2102_v37, %v2038_v21  ;;  %v2588_v10 = vpop.f32.mrb[34].mxu1  ;;  %v2057_v4 = vadd.f32 %v2530_v34, %v1992_v26  ;;  %v2137_v21 = vld [vmem:[%s3714_s11 + $0x20] sm:$0xff] }
 0x374   : > { %v2143_v58 = vadd.f32 %v2135_v29, %v2111_v52  ;;  %v2114_v30 = vadd.f32 %v2588_v10, %v2049_v2  ;;  %v2105_v5 = vpop.f32.mrb[35].mxu1 }
 0x375   : > { %v2141_v60 = vadd.f32 %v2133_v56, %v2103_v33  ;;  %v2106_v50 = vadd.f32 %v2105_v5, %v2041_v35  ;;  %v2531_v62 = vpop.f32.mrb[44].mxu0 }
 0x376   : > { %v2368_v44 = vmul.f32 -1.442695, %v2143_v58  ;;  %v2144_v6 = vadd.f32 %v2136_v3, %v2114_v30  ;;  %v2532_v45 = vpop.f32.mrb[45].mxu0 }
 0x377   : > { %v2366_v15 = vmul.f32 -1.442695, %v2141_v60  ;;  %v2142_v9 = vadd.f32 %v2134_v27, %v2106_v50  ;;  %v2533_v16 = vadd.f32 %v2532_v45, %v2531_v62  ;;  %v2534_v61 = vpop.f32.mrb[46].mxu0 }
 0x378   : > { %2688 = vpow2.f32 %v2368_v44  ;;  %v2369_v55 = vmul.f32 -1.442695, %v2144_v6  ;;  %v2535_v22 = vpop.f32.mrb[47].mxu0 }
 0x379   : > { %2690 = vpow2.f32 %v2366_v15  ;;  %v2367_v12 = vmul.f32 -1.442695, %v2142_v9  ;;  %v2591_v36 = vpop.f32.mrb[36].mxu1  ;;  %v2536_v48 = vadd.f32 %v2535_v22, %v2534_v61  ;;  %v2062_v32 = vadd.f32 %v2533_v16, %v1997_v19 }
 0x37a   : > { %2692 = vpow2.f32 %v2369_v55  ;;  %v2118_v63 = vpop.f32.mrb[37].mxu1 }
 0x37b   : > { %2694 = vpow2.f32 %v2367_v12  ;;  %v2119_v54 = vadd.f32 %v2118_v63, %v2054_v20  ;;  %v2592_v24 = vpop.f32.mrb[38].mxu1  ;;  %v2127_v35 = vadd.f32 %v2591_v36, %v2062_v32  ;;  %v2065_v59 = vadd.f32 %v2536_v48, %v2000_v25 }
 0x37c   : > { %v2121_v14 = vpop.f32.mrb[39].mxu1 }
 0x37d   : > { %v2145_v47 = vadd.f32 %v2137_v21, %v2119_v54  ;;  %v2122_v51 = vadd.f32 %v2121_v14, %v2057_v4  ;;  %v2147_v41 = vadd.f32 %v2139_v23, %v2127_v35  ;;  %v2130_v49 = vadd.f32 %v2592_v24, %v2065_v59 }
 0x37f   : > { %v2370_v28 = vmul.f32 -1.442695, %v2145_v47  ;;  %v2146_v42 = vadd.f32 %v2138_v18, %v2122_v51  ;;  %v2372_v13 = vmul.f32 -1.442695, %v2147_v41  ;;  %v2148_v43 = vadd.f32 %v2140_v8, %v2130_v49 }
 0x381   : > { %2696 = vpow2.f32 %v2370_v28  ;;  %v2371_v31 = vmul.f32 -1.442695, %v2146_v42  ;;  %v2373_v7 = vmul.f32 -1.442695, %v2148_v43 }
 0x382   : > { %v2689_v38 = vpop.eup %2688  ;;  %2698 = vpow2.f32 %v2372_v13 }
 0x383   : > { %v2691_v40 = vpop.eup %2690  ;;  %v2175_v2 = vadd.f32 1.0, %v2689_v38  ;;  %2700 = vpow2.f32 %v2371_v31 }
 0x384   : > { %v2693_v53 = vpop.eup %2692  ;;  %v2173_v0 = vadd.f32 1.0, %v2691_v40  ;;  %2702 = vpow2.f32 %v2373_v7 }
 0x385   : > { %v2695_v39 = vpop.eup %2694  ;;  %2704 = vrcp.f32 %v2175_v2  ;;  %v2176_v17 = vadd.f32 1.0, %v2693_v53 }
 0x386   : > { %2706 = vrcp.f32 %v2173_v0  ;;  %v2174_v57 = vadd.f32 1.0, %v2695_v39 }
 0x387   : > { %2708 = vrcp.f32 %v2176_v17 }
 0x388   : > { %2710 = vrcp.f32 %v2174_v57 }
 0x38b   : > { %v2697_v1 = vpop.eup %2696 }
 0x38c   : > { %v2699_v46 = vpop.eup %2698  ;;  %v2177_v11 = vadd.f32 1.0, %v2697_v1 }
 0x38d   : > { %v2701_v29 = vpop.eup %2700  ;;  %v2179_v26 = vadd.f32 1.0, %v2699_v46 }
 0x38e   : > { %v2703_v34 = vpop.eup %2702  ;;  %2712 = vrcp.f32 %v2177_v11  ;;  %v2178_v52 = vadd.f32 1.0, %v2701_v29 }
 0x38f   : > { %v2705_v37 = vpop.eup %2704  ;;  %2714 = vrcp.f32 %v2179_v26  ;;  %v2180_v56 = vadd.f32 1.0, %v2703_v34 }
 0x390   : > { %v2707_v20 = vpop.eup %2706  ;;  %2200 = vst.msk [vmem:[%s280_s19 + $0x10] sm:$0xff] %vm2197_vm13, %v2705_v37  ;;  %2716 = vrcp.f32 %v2178_v52 }
 0x391   : > { %v2709_v33 = vpop.eup %2708  ;;  %2198 = vst.msk [vmem:[%s280_s19] sm:$0xff] %vm2197_vm13, %v2707_v20  ;;  %2718 = vrcp.f32 %v2180_v56 }
 0x392   : > { %v2711_v10 = vpop.eup %2710  ;;  %2201 = vst.msk [vmem:[%s280_s19 + $0x18] sm:$0xff] %vm2197_vm13, %v2709_v33 }
 0x393   : > { %2199 = vst.msk [vmem:[%s280_s19 + $0x8] sm:$0xff] %vm2197_vm13, %v2711_v10 }
 0x398   : > { %v2713_v3 = vpop.eup %2712 }
 0x399   : > { %v2715_v58 = vpop.eup %2714  ;;  %2202 = vst.msk [vmem:[%s280_s19 + $0x20] sm:$0xff] %vm2197_vm13, %v2713_v3 }
 0x39a   : > { %v2717_v30 = vpop.eup %2716  ;;  %2204 = vst.msk [vmem:[%s280_s19 + $0x30] sm:$0xff] %vm2197_vm13, %v2715_v58 }
 0x39b   : > { %v2719_v5 = vpop.eup %2718  ;;  %2203 = vst.msk [vmem:[%s280_s19 + $0x28] sm:$0xff] %vm2197_vm13, %v2717_v30 }
 0x39c   : > { %2205 = vst.msk [vmem:[%s280_s19 + $0x38] sm:$0xff] %vm2197_vm13, %v2719_v5 }
 0x39d PF: > { %s17_s24 = sadd.s32 1, %s2726_s24  }
 0x39e   : > { %p14_p4 = scmp.ge.s32.totalorder %s17_s24, 6  }
 0x3a0   :  { %16 = sbr.rel (!%p14_p4) target bundleno = 1 (0x1), region = 79 }

</bundles_post_ra>
